<compile_context>
chip_gen: v7x
topology: tpu7x:2x2x1
jax: 0.10.0
libtpu: 0.0.40
codegen_flags: <defaults>
</compile_context>

<pallas_src>
import jax
import jax.numpy as jnp
from jax.experimental import pallas as pl
from jax.experimental.pallas import tpu as pltpu


def time_aware_lstm_kernel(
    xcat_ref,                     # (T, Bb, D+E)  time-major [x, time_enc]
    wih1_ref, b1_ref, whh1_ref,   # (D+E, 4H), (1, 4H), (H, 4H)
    wih2_ref, b2_ref, whh2_ref,   # (H, 4H),   (1, 4H), (H, 4H)
    wa1_ref, ba1_ref,             # (H, 64),   (1, 64)
    wa2_ref, ba2_ref,             # (1, 64),   (1, 1)
    wc_ref, bc_ref,               # (1, H),    (1, 1)
    o_ref,                        # (Bb, 1)
):
    T, B, DE = xcat_ref.shape
    H = whh1_ref.shape[0]
    f32 = jnp.float32

    # ---- Layer-1 input projection for every timestep in one MXU matmul.
    xp1 = (jnp.dot(xcat_ref[...].reshape(T * B, DE), wih1_ref[...],
                   preferred_element_type=f32)
           + b1_ref[...]).reshape(T, B, 4 * H)       # (T, B, 4H), time-major

    whh1 = whh1_ref[...]
    wih2 = wih2_ref[...]
    b2 = b2_ref[...]
    whh2 = whh2_ref[...]

    def cell(gates, c_prev):
        # Whole-vreg activations (4H == 128 lanes): one sigmoid pass + one tanh
        # pass over the full gate vector, then static lane slices (i, f, g, o).
        sg = jax.nn.sigmoid(gates)
        tg = jnp.tanh(gates)
        i_g = sg[:, 0:H]
        f_g = sg[:, H:2 * H]
        o_g = sg[:, 3 * H:4 * H]
        c_g = tg[:, 2 * H:3 * H]
        c_new = f_g * c_prev + i_g * c_g
        h_new = o_g * jnp.tanh(c_new)
        return h_new, c_new

    h1 = jnp.zeros((B, H), f32)
    c1 = jnp.zeros((B, H), f32)
    h2 = jnp.zeros((B, H), f32)
    c2 = jnp.zeros((B, H), f32)
    h2_seq = []

    # ---- Fused 2-layer recurrence, fully unrolled (T is small & static), so
    #      the LLO scheduler can co-issue MXU pushes with VPU/EUP gate math.
    for t in range(T):
        g1 = xp1[t] + jnp.dot(h1, whh1, preferred_element_type=f32)
        h1, c1 = cell(g1, c1)
        # TODO(synk): inter-layer dropout (p=0.2) is training-only -> identity.
        g2 = (jnp.dot(h1, wih2, preferred_element_type=f32) + b2
              + jnp.dot(h2, whh2, preferred_element_type=f32))
        h2, c2 = cell(g2, c2)
        h2_seq.append(h2)

    out2 = jnp.stack(h2_seq, axis=1)                 # (B, T, H)

    # ---- Attention: Linear(H, 64) -> tanh -> Linear(64, 1) as a lane reduce.
    a1 = jnp.tanh(jnp.dot(out2.reshape(B * T, H), wa1_ref[...],
                          preferred_element_type=f32)
                  + ba1_ref[...])                    # (B*T, 64)
    a1 = a1.reshape(B, T, 64)
    scores = jnp.sum(a1 * wa2_ref[...], axis=-1) + ba2_ref[...]   # (B, T) lane-major
    scores = scores - jnp.max(scores, axis=-1, keepdims=True)
    exp_s = jnp.exp(scores)
    attn = exp_s / jnp.sum(exp_s, axis=-1, keepdims=True)         # softmax over time

    # ---- Weighted context + classifier (N=1 matmul -> VPU reduce) + sigmoid.
    context = jnp.sum(attn[:, :, None] * out2, axis=1)            # (B, H)
    logits = (jnp.sum(context * wc_ref[...], axis=-1, keepdims=True)
              + bc_ref[...])                                      # (B, 1)
    o_ref[...] = jax.nn.sigmoid(logits)


def time_aware_patient_lstm(x, time_intervals, params, *, batch_block=None):
    (wt, bt, wih1, b1, whh1, wih2, b2, whh2,
     wa1, ba1, wa2, ba2, wc, bc) = params
    B, T, D = x.shape
    E = wt.shape[1]
    DE = D + E
    H = whh1.shape[0]

    # Time encoder (Linear(1, E) is a broadcast) + feature concat in plain JAX,
    # then go time-major so the kernel slices the gate projections on the
    # leading axis.
    te = time_intervals * wt + bt                    # (B, T, E)
    xcat = jnp.concatenate([x, te], axis=2)          # (B, T, D+E)
    xcat = jnp.transpose(xcat, (1, 0, 2))            # (T, B, D+E)

    # Batch grid axis: shards large batches across TensorCores (v7x); degenerates
    # to a single invocation at small B.
    if batch_block is None:
        batch_block = B if B <= 128 else 128
    assert B % batch_block == 0, "batch must be divisible by batch_block"
    grid = (B // batch_block,)

    weights = (wih1, b1, whh1, wih2, b2, whh2, wa1, ba1, wa2, ba2, wc, bc)

    def full_spec(arr):
        return pl.BlockSpec(arr.shape, lambda i: (0,) * arr.ndim)

    in_specs = [pl.BlockSpec((T, batch_block, DE), lambda i: (0, i, 0))]
    in_specs += [full_spec(w) for w in weights]
    out_specs = pl.BlockSpec((batch_block, 1), lambda i: (i, 0))

    # Advisory cost hint for the XLA scheduler.
    flops = (2 * T * B * DE * 4 * H              # layer-1 input projection
             + 3 * 2 * T * B * H * 4 * H         # whh1, wih2, whh2 per step
             + 2 * B * T * H * 64                # attention hidden
             + 2 * B * T * 64                    # attention score reduce
             + 2 * B * T * H                     # context
             + 2 * B * H)                        # classifier
    transcendentals = T * B * (4 * 4 * H + 2 * H) + B * T * 64 + B * T + B
    bytes_accessed = 4 * (xcat.size + sum(int(w.size) for w in weights) + B)

    return pl.pallas_call(
        time_aware_lstm_kernel,
        out_shape=jax.ShapeDtypeStruct((B, 1), jnp.float32),
        grid=grid,
        in_specs=in_specs,
        out_specs=out_specs,
        compiler_params=pltpu.CompilerParams(
            dimension_semantics=("parallel",)),
        cost_estimate=pl.CostEstimate(
            flops=flops, transcendentals=transcendentals,
            bytes_accessed=bytes_accessed),
    )(xcat, *weights)


def init_params(key, input_dim, hidden_dim, time_embed_dim):
    """Deterministic synthetic parameters, pre-transposed to (in, out)."""
    D, H, E = input_dim, hidden_dim, time_embed_dim
    keys = jax.random.split(key, 16)
    s = 0.1

    def rnd(k, shape):
        return (s * jax.random.normal(k, shape)).astype(jnp.float32)

    wt = rnd(keys[0], (1, E))                       # TimeEncoder Linear(1, E)
    bt = rnd(keys[1], (1, E))
    wih1 = rnd(keys[2], (D + E, 4 * H))             # weight_ih_l0^T ([x, time])
    whh1 = rnd(keys[3], (H, 4 * H))                 # weight_hh_l0^T
    b1 = rnd(keys[4], (1, 4 * H)) + rnd(keys[5], (1, 4 * H))   # b_ih + b_hh
    wih2 = rnd(keys[6], (H, 4 * H))                 # weight_ih_l1^T
    whh2 = rnd(keys[7], (H, 4 * H))                 # weight_hh_l1^T
    b2 = rnd(keys[8], (1, 4 * H)) + rnd(keys[9], (1, 4 * H))
    wa1 = rnd(keys[10], (H, 64))                    # attention Linear(H, 64)
    ba1 = rnd(keys[11], (1, 64))
    wa2 = rnd(keys[12], (1, 64))                    # attention Linear(64, 1) weight (row)
    ba2 = jnp.zeros((1, 1), jnp.float32)
    wc = rnd(keys[13], (1, H))                      # classifier Linear(H, 1) weight (row)
    bc = rnd(keys[14], (1, 1))
    return (wt, bt, wih1, b1, whh1, wih2, b2, whh2,
            wa1, ba1, wa2, ba2, wc, bc)


def reference_forward(x, ti, params):
    """Pure-JAX reference with identical math (for validation)."""
    (wt, bt, wih1, b1, whh1, wih2, b2, whh2,
     wa1, ba1, wa2, ba2, wc, bc) = params
    B, T, D = x.shape
    H = whh1.shape[0]

    te = ti * wt + bt
    xc = jnp.concatenate([x, te], axis=2)                        # (B, T, D+E)
    xp1 = jnp.einsum('btk,kg->btg', xc, wih1) + b1               # (B, T, 4H)

    def run_layer(xp, whh):
        h = jnp.zeros((B, H), jnp.float32)
        c = jnp.zeros((B, H), jnp.float32)
        outs = []
        for t in range(T):
            g = xp[:, t, :] + h @ whh
            i_g = jax.nn.sigmoid(g[:, 0:H])
            f_g = jax.nn.sigmoid(g[:, H:2 * H])
            c_g = jnp.tanh(g[:, 2 * H:3 * H])
            o_g = jax.nn.sigmoid(g[:, 3 * H:4 * H])
            c = f_g * c + i_g * c_g
            h = o_g * jnp.tanh(c)
            outs.append(h)
        return jnp.stack(outs, axis=1)

    out1 = run_layer(xp1, whh1)
    xp2 = jnp.einsum('bth,hg->btg', out1, wih2) + b2
    out2 = run_layer(xp2, whh2)

    a1 = jnp.tanh(jnp.einsum('bth,hk->btk', out2, wa1) + ba1)    # (B, T, 64)
    scores = jnp.sum(a1 * wa2, axis=-1, keepdims=True) + ba2     # (B, T, 1)
    attn = jax.nn.softmax(scores, axis=1)
    context = jnp.sum(attn * out2, axis=1)                       # (B, H)
    return jax.nn.sigmoid(jnp.sum(context * wc, axis=-1, keepdims=True) + bc)


if __name__ == "__main__":
    B, T = 2, 8
    input_dim, hidden_dim, time_embed_dim = 20, 32, 16

    key = jax.random.PRNGKey(0)
    kx, kt, kp = jax.random.split(key, 3)
    x = jax.random.normal(kx, (B, T, input_dim), dtype=jnp.float32)
    time_intervals = jax.random.uniform(kt, (B, T, 1), dtype=jnp.float32)
    params = init_params(kp, input_dim, hidden_dim, time_embed_dim)

    out = jax.block_until_ready(time_aware_patient_lstm(x, time_intervals, params))

    ref = reference_forward(x, time_intervals, params)
    assert out.shape == (B, 1)
    assert jnp.allclose(out, ref, atol=1e-4, rtol=1e-4), (out, ref)

    print("KERNEL_OK")
</pallas_src>

<mosaic_0001>
module attributes {stable_mosaic.version = 11 : i64} {
  func.func @time_aware_lstm_kernel(%arg0: i32, %arg1: memref<8x2x36xf32, #tpu.memory_space<vmem>>, %arg2: memref<36x128xf32, #tpu.memory_space<vmem>>, %arg3: memref<1x128xf32, #tpu.memory_space<vmem>>, %arg4: memref<32x128xf32, #tpu.memory_space<vmem>>, %arg5: memref<32x128xf32, #tpu.memory_space<vmem>>, %arg6: memref<1x128xf32, #tpu.memory_space<vmem>>, %arg7: memref<32x128xf32, #tpu.memory_space<vmem>>, %arg8: memref<32x64xf32, #tpu.memory_space<vmem>>, %arg9: memref<1x64xf32, #tpu.memory_space<vmem>>, %arg10: memref<1x64xf32, #tpu.memory_space<vmem>>, %arg11: memref<1x1xf32, #tpu.memory_space<vmem>>, %arg12: memref<1x32xf32, #tpu.memory_space<vmem>>, %arg13: memref<1x1xf32, #tpu.memory_space<vmem>>, %arg14: memref<2x1xf32, #tpu.memory_space<vmem>>) attributes {dimension_semantics = [#tpu.dimension_semantics<parallel>], iteration_bounds = array<i64: 1>, scalar_prefetch = 0 : i64, scratch_operands = 0 : i64, tpu.core_type = #tpu.core_type<tc>, window_params = [{transform_indices = @transform_0, window_bounds = array<i64: 8, 2, 36>}, {pipeline_mode = #tpu.pipeline_mode<synchronous>, transform_indices = @transform_1, window_bounds = array<i64: 36, 128>}, {pipeline_mode = #tpu.pipeline_mode<synchronous>, transform_indices = @transform_2, window_bounds = array<i64: 1, 128>}, {pipeline_mode = #tpu.pipeline_mode<synchronous>, transform_indices = @transform_3, window_bounds = array<i64: 32, 128>}, {pipeline_mode = #tpu.pipeline_mode<synchronous>, transform_indices = @transform_4, window_bounds = array<i64: 32, 128>}, {pipeline_mode = #tpu.pipeline_mode<synchronous>, transform_indices = @transform_5, window_bounds = array<i64: 1, 128>}, {pipeline_mode = #tpu.pipeline_mode<synchronous>, transform_indices = @transform_6, window_bounds = array<i64: 32, 128>}, {pipeline_mode = #tpu.pipeline_mode<synchronous>, transform_indices = @transform_7, window_bounds = array<i64: 32, 64>}, {pipeline_mode = #tpu.pipeline_mode<synchronous>, transform_indices = @transform_8, window_bounds = array<i64: 1, 64>}, {pipeline_mode = #tpu.pipeline_mode<synchronous>, transform_indices = @transform_9, window_bounds = array<i64: 1, 64>}, {pipeline_mode = #tpu.pipeline_mode<synchronous>, transform_indices = @transform_10, window_bounds = array<i64: 1, 1>}, {pipeline_mode = #tpu.pipeline_mode<synchronous>, transform_indices = @transform_11, window_bounds = array<i64: 1, 32>}, {pipeline_mode = #tpu.pipeline_mode<synchronous>, transform_indices = @transform_12, window_bounds = array<i64: 1, 1>}, {transform_indices = @transform_13, window_bounds = array<i64: 2, 1>}]} {
    %c0 = arith.constant 0 : index
    %c0_0 = arith.constant 0 : index
    %c0_1 = arith.constant 0 : index
    %0 = vector.load %arg1[%c0, %c0_0, %c0_1] : memref<8x2x36xf32, #tpu.memory_space<vmem>>, vector<8x2x36xf32>
    %1 = vector.shape_cast %0 : vector<8x2x36xf32> to vector<16x36xf32>
    %c0_2 = arith.constant 0 : index
    %c0_3 = arith.constant 0 : index
    %2 = vector.load %arg2[%c0_2, %c0_3] : memref<36x128xf32, #tpu.memory_space<vmem>>, vector<36x128xf32>
    %cst = arith.constant dense<0.000000e+00> : vector<16x128xf32>
    %3 = tpu.matmul %1, %2, %cst {dimension_numbers = #tpu.dot_dimension_numbers<[1], [0], [0], [1], [0, 0, 1, 1], [], []>} : vector<16x36xf32>, vector<36x128xf32>, vector<16x128xf32> -> vector<16x128xf32>
    %c0_4 = arith.constant 0 : index
    %c0_5 = arith.constant 0 : index
    %4 = vector.load %arg3[%c0_4, %c0_5] : memref<1x128xf32, #tpu.memory_space<vmem>>, vector<1x128xf32>
    %5 = vector.broadcast %4 : vector<1x128xf32> to vector<16x128xf32>
    %6 = arith.addf %3, %5 : vector<16x128xf32>
    %7 = vector.shape_cast %6 : vector<16x128xf32> to vector<8x2x128xf32>
    %c0_6 = arith.constant 0 : index
    %c0_7 = arith.constant 0 : index
    %8 = vector.load %arg4[%c0_6, %c0_7] : memref<32x128xf32, #tpu.memory_space<vmem>>, vector<32x128xf32>
    %c0_8 = arith.constant 0 : index
    %c0_9 = arith.constant 0 : index
    %9 = vector.load %arg5[%c0_8, %c0_9] : memref<32x128xf32, #tpu.memory_space<vmem>>, vector<32x128xf32>
    %c0_10 = arith.constant 0 : index
    %c0_11 = arith.constant 0 : index
    %10 = vector.load %arg6[%c0_10, %c0_11] : memref<1x128xf32, #tpu.memory_space<vmem>>, vector<1x128xf32>
    %c0_12 = arith.constant 0 : index
    %c0_13 = arith.constant 0 : index
    %11 = vector.load %arg7[%c0_12, %c0_13] : memref<32x128xf32, #tpu.memory_space<vmem>>, vector<32x128xf32>
    %cst_14 = arith.constant 0.000000e+00 : f32
    %12 = vector.broadcast %cst_14 : f32 to vector<2x32xf32>
    %cst_15 = arith.constant 0.000000e+00 : f32
    %13 = vector.broadcast %cst_15 : f32 to vector<2x32xf32>
    %cst_16 = arith.constant 0.000000e+00 : f32
    %14 = vector.broadcast %cst_16 : f32 to vector<2x32xf32>
    %cst_17 = arith.constant 0.000000e+00 : f32
    %15 = vector.broadcast %cst_17 : f32 to vector<2x32xf32>
    %16 = vector.extract_strided_slice %7 {offsets = [0, 0, 0], sizes = [1, 2, 128], strides = [1, 1, 1]} : vector<8x2x128xf32> to vector<1x2x128xf32>
    %17 = vector.shape_cast %16 : vector<1x2x128xf32> to vector<2x128xf32>
    %cst_18 = arith.constant dense<0.000000e+00> : vector<2x128xf32>
    %18 = tpu.matmul %12, %8, %cst_18 {dimension_numbers = #tpu.dot_dimension_numbers<[1], [0], [0], [1], [0, 0, 1, 1], [], []>} : vector<2x32xf32>, vector<32x128xf32>, vector<2x128xf32> -> vector<2x128xf32>
    %19 = arith.addf %17, %18 : vector<2x128xf32>
    %20 = arith.negf %19 : vector<2x128xf32>
    %21 = math.exp %20 : vector<2x128xf32>
    %cst_19 = arith.constant 1.000000e+00 : f32
    %22 = vector.broadcast %cst_19 : f32 to vector<2x128xf32>
    %23 = arith.addf %22, %21 : vector<2x128xf32>
    %24 = arith.divf %22, %23 : vector<2x128xf32>
    %25 = math.tanh %19 : vector<2x128xf32>
    %26 = vector.extract_strided_slice %24 {offsets = [0, 0], sizes = [2, 32], strides = [1, 1]} : vector<2x128xf32> to vector<2x32xf32>
    %27 = vector.extract_strided_slice %24 {offsets = [0, 32], sizes = [2, 32], strides = [1, 1]} : vector<2x128xf32> to vector<2x32xf32>
    %28 = vector.extract_strided_slice %24 {offsets = [0, 96], sizes = [2, 32], strides = [1, 1]} : vector<2x128xf32> to vector<2x32xf32>
    %29 = vector.extract_strided_slice %25 {offsets = [0, 64], sizes = [2, 32], strides = [1, 1]} : vector<2x128xf32> to vector<2x32xf32>
    %30 = arith.mulf %27, %13 : vector<2x32xf32>
    %31 = arith.mulf %26, %29 : vector<2x32xf32>
    %32 = arith.addf %30, %31 : vector<2x32xf32>
    %33 = math.tanh %32 : vector<2x32xf32>
    %34 = arith.mulf %28, %33 : vector<2x32xf32>
    %cst_20 = arith.constant dense<0.000000e+00> : vector<2x128xf32>
    %35 = tpu.matmul %34, %9, %cst_20 {dimension_numbers = #tpu.dot_dimension_numbers<[1], [0], [0], [1], [0, 0, 1, 1], [], []>} : vector<2x32xf32>, vector<32x128xf32>, vector<2x128xf32> -> vector<2x128xf32>
    %36 = vector.broadcast %10 : vector<1x128xf32> to vector<2x128xf32>
    %37 = arith.addf %35, %36 : vector<2x128xf32>
    %cst_21 = arith.constant dense<0.000000e+00> : vector<2x128xf32>
    %38 = tpu.matmul %14, %11, %cst_21 {dimension_numbers = #tpu.dot_dimension_numbers<[1], [0], [0], [1], [0, 0, 1, 1], [], []>} : vector<2x32xf32>, vector<32x128xf32>, vector<2x128xf32> -> vector<2x128xf32>
    %39 = arith.addf %37, %38 : vector<2x128xf32>
    %40 = arith.negf %39 : vector<2x128xf32>
    %41 = math.exp %40 : vector<2x128xf32>
    %cst_22 = arith.constant 1.000000e+00 : f32
    %42 = vector.broadcast %cst_22 : f32 to vector<2x128xf32>
    %43 = arith.addf %42, %41 : vector<2x128xf32>
    %44 = arith.divf %42, %43 : vector<2x128xf32>
    %45 = math.tanh %39 : vector<2x128xf32>
    %46 = vector.extract_strided_slice %44 {offsets = [0, 0], sizes = [2, 32], strides = [1, 1]} : vector<2x128xf32> to vector<2x32xf32>
    %47 = vector.extract_strided_slice %44 {offsets = [0, 32], sizes = [2, 32], strides = [1, 1]} : vector<2x128xf32> to vector<2x32xf32>
    %48 = vector.extract_strided_slice %44 {offsets = [0, 96], sizes = [2, 32], strides = [1, 1]} : vector<2x128xf32> to vector<2x32xf32>
    %49 = vector.extract_strided_slice %45 {offsets = [0, 64], sizes = [2, 32], strides = [1, 1]} : vector<2x128xf32> to vector<2x32xf32>
    %50 = arith.mulf %47, %15 : vector<2x32xf32>
    %51 = arith.mulf %46, %49 : vector<2x32xf32>
    %52 = arith.addf %50, %51 : vector<2x32xf32>
    %53 = math.tanh %52 : vector<2x32xf32>
    %54 = arith.mulf %48, %53 : vector<2x32xf32>
    %55 = vector.extract_strided_slice %7 {offsets = [1, 0, 0], sizes = [1, 2, 128], strides = [1, 1, 1]} : vector<8x2x128xf32> to vector<1x2x128xf32>
    %56 = vector.shape_cast %55 : vector<1x2x128xf32> to vector<2x128xf32>
    %cst_23 = arith.constant dense<0.000000e+00> : vector<2x128xf32>
    %57 = tpu.matmul %34, %8, %cst_23 {dimension_numbers = #tpu.dot_dimension_numbers<[1], [0], [0], [1], [0, 0, 1, 1], [], []>} : vector<2x32xf32>, vector<32x128xf32>, vector<2x128xf32> -> vector<2x128xf32>
    %58 = arith.addf %56, %57 : vector<2x128xf32>
    %59 = arith.negf %58 : vector<2x128xf32>
    %60 = math.exp %59 : vector<2x128xf32>
    %cst_24 = arith.constant 1.000000e+00 : f32
    %61 = vector.broadcast %cst_24 : f32 to vector<2x128xf32>
    %62 = arith.addf %61, %60 : vector<2x128xf32>
    %63 = arith.divf %61, %62 : vector<2x128xf32>
    %64 = math.tanh %58 : vector<2x128xf32>
    %65 = vector.extract_strided_slice %63 {offsets = [0, 0], sizes = [2, 32], strides = [1, 1]} : vector<2x128xf32> to vector<2x32xf32>
    %66 = vector.extract_strided_slice %63 {offsets = [0, 32], sizes = [2, 32], strides = [1, 1]} : vector<2x128xf32> to vector<2x32xf32>
    %67 = vector.extract_strided_slice %63 {offsets = [0, 96], sizes = [2, 32], strides = [1, 1]} : vector<2x128xf32> to vector<2x32xf32>
    %68 = vector.extract_strided_slice %64 {offsets = [0, 64], sizes = [2, 32], strides = [1, 1]} : vector<2x128xf32> to vector<2x32xf32>
    %69 = arith.mulf %66, %32 : vector<2x32xf32>
    %70 = arith.mulf %65, %68 : vector<2x32xf32>
    %71 = arith.addf %69, %70 : vector<2x32xf32>
    %72 = math.tanh %71 : vector<2x32xf32>
    %73 = arith.mulf %67, %72 : vector<2x32xf32>
    %cst_25 = arith.constant dense<0.000000e+00> : vector<2x128xf32>
    %74 = tpu.matmul %73, %9, %cst_25 {dimension_numbers = #tpu.dot_dimension_numbers<[1], [0], [0], [1], [0, 0, 1, 1], [], []>} : vector<2x32xf32>, vector<32x128xf32>, vector<2x128xf32> -> vector<2x128xf32>
    %75 = vector.broadcast %10 : vector<1x128xf32> to vector<2x128xf32>
    %76 = arith.addf %74, %75 : vector<2x128xf32>
    %cst_26 = arith.constant dense<0.000000e+00> : vector<2x128xf32>
    %77 = tpu.matmul %54, %11, %cst_26 {dimension_numbers = #tpu.dot_dimension_numbers<[1], [0], [0], [1], [0, 0, 1, 1], [], []>} : vector<2x32xf32>, vector<32x128xf32>, vector<2x128xf32> -> vector<2x128xf32>
    %78 = arith.addf %76, %77 : vector<2x128xf32>
    %79 = arith.negf %78 : vector<2x128xf32>
    %80 = math.exp %79 : vector<2x128xf32>
    %cst_27 = arith.constant 1.000000e+00 : f32
    %81 = vector.broadcast %cst_27 : f32 to vector<2x128xf32>
    %82 = arith.addf %81, %80 : vector<2x128xf32>
    %83 = arith.divf %81, %82 : vector<2x128xf32>
    %84 = math.tanh %78 : vector<2x128xf32>
    %85 = vector.extract_strided_slice %83 {offsets = [0, 0], sizes = [2, 32], strides = [1, 1]} : vector<2x128xf32> to vector<2x32xf32>
    %86 = vector.extract_strided_slice %83 {offsets = [0, 32], sizes = [2, 32], strides = [1, 1]} : vector<2x128xf32> to vector<2x32xf32>
    %87 = vector.extract_strided_slice %83 {offsets = [0, 96], sizes = [2, 32], strides = [1, 1]} : vector<2x128xf32> to vector<2x32xf32>
    %88 = vector.extract_strided_slice %84 {offsets = [0, 64], sizes = [2, 32], strides = [1, 1]} : vector<2x128xf32> to vector<2x32xf32>
    %89 = arith.mulf %86, %52 : vector<2x32xf32>
    %90 = arith.mulf %85, %88 : vector<2x32xf32>
    %91 = arith.addf %89, %90 : vector<2x32xf32>
    %92 = math.tanh %91 : vector<2x32xf32>
    %93 = arith.mulf %87, %92 : vector<2x32xf32>
    %94 = vector.extract_strided_slice %7 {offsets = [2, 0, 0], sizes = [1, 2, 128], strides = [1, 1, 1]} : vector<8x2x128xf32> to vector<1x2x128xf32>
    %95 = vector.shape_cast %94 : vector<1x2x128xf32> to vector<2x128xf32>
    %cst_28 = arith.constant dense<0.000000e+00> : vector<2x128xf32>
    %96 = tpu.matmul %73, %8, %cst_28 {dimension_numbers = #tpu.dot_dimension_numbers<[1], [0], [0], [1], [0, 0, 1, 1], [], []>} : vector<2x32xf32>, vector<32x128xf32>, vector<2x128xf32> -> vector<2x128xf32>
    %97 = arith.addf %95, %96 : vector<2x128xf32>
    %98 = arith.negf %97 : vector<2x128xf32>
    %99 = math.exp %98 : vector<2x128xf32>
    %cst_29 = arith.constant 1.000000e+00 : f32
    %100 = vector.broadcast %cst_29 : f32 to vector<2x128xf32>
    %101 = arith.addf %100, %99 : vector<2x128xf32>
    %102 = arith.divf %100, %101 : vector<2x128xf32>
    %103 = math.tanh %97 : vector<2x128xf32>
    %104 = vector.extract_strided_slice %102 {offsets = [0, 0], sizes = [2, 32], strides = [1, 1]} : vector<2x128xf32> to vector<2x32xf32>
    %105 = vector.extract_strided_slice %102 {offsets = [0, 32], sizes = [2, 32], strides = [1, 1]} : vector<2x128xf32> to vector<2x32xf32>
    %106 = vector.extract_strided_slice %102 {offsets = [0, 96], sizes = [2, 32], strides = [1, 1]} : vector<2x128xf32> to vector<2x32xf32>
    %107 = vector.extract_strided_slice %103 {offsets = [0, 64], sizes = [2, 32], strides = [1, 1]} : vector<2x128xf32> to vector<2x32xf32>
    %108 = arith.mulf %105, %71 : vector<2x32xf32>
    %109 = arith.mulf %104, %107 : vector<2x32xf32>
    %110 = arith.addf %108, %109 : vector<2x32xf32>
    %111 = math.tanh %110 : vector<2x32xf32>
    %112 = arith.mulf %106, %111 : vector<2x32xf32>
    %cst_30 = arith.constant dense<0.000000e+00> : vector<2x128xf32>
    %113 = tpu.matmul %112, %9, %cst_30 {dimension_numbers = #tpu.dot_dimension_numbers<[1], [0], [0], [1], [0, 0, 1, 1], [], []>} : vector<2x32xf32>, vector<32x128xf32>, vector<2x128xf32> -> vector<2x128xf32>
    %114 = vector.broadcast %10 : vector<1x128xf32> to vector<2x128xf32>
    %115 = arith.addf %113, %114 : vector<2x128xf32>
    %cst_31 = arith.constant dense<0.000000e+00> : vector<2x128xf32>
    %116 = tpu.matmul %93, %11, %cst_31 {dimension_numbers = #tpu.dot_dimension_numbers<[1], [0], [0], [1], [0, 0, 1, 1], [], []>} : vector<2x32xf32>, vector<32x128xf32>, vector<2x128xf32> -> vector<2x128xf32>
    %117 = arith.addf %115, %116 : vector<2x128xf32>
    %118 = arith.negf %117 : vector<2x128xf32>
    %119 = math.exp %118 : vector<2x128xf32>
    %cst_32 = arith.constant 1.000000e+00 : f32
    %120 = vector.broadcast %cst_32 : f32 to vector<2x128xf32>
    %121 = arith.addf %120, %119 : vector<2x128xf32>
    %122 = arith.divf %120, %121 : vector<2x128xf32>
    %123 = math.tanh %117 : vector<2x128xf32>
    %124 = vector.extract_strided_slice %122 {offsets = [0, 0], sizes = [2, 32], strides = [1, 1]} : vector<2x128xf32> to vector<2x32xf32>
    %125 = vector.extract_strided_slice %122 {offsets = [0, 32], sizes = [2, 32], strides = [1, 1]} : vector<2x128xf32> to vector<2x32xf32>
    %126 = vector.extract_strided_slice %122 {offsets = [0, 96], sizes = [2, 32], strides = [1, 1]} : vector<2x128xf32> to vector<2x32xf32>
    %127 = vector.extract_strided_slice %123 {offsets = [0, 64], sizes = [2, 32], strides = [1, 1]} : vector<2x128xf32> to vector<2x32xf32>
    %128 = arith.mulf %125, %91 : vector<2x32xf32>
    %129 = arith.mulf %124, %127 : vector<2x32xf32>
    %130 = arith.addf %128, %129 : vector<2x32xf32>
    %131 = math.tanh %130 : vector<2x32xf32>
    %132 = arith.mulf %126, %131 : vector<2x32xf32>
    %133 = vector.extract_strided_slice %7 {offsets = [3, 0, 0], sizes = [1, 2, 128], strides = [1, 1, 1]} : vector<8x2x128xf32> to vector<1x2x128xf32>
    %134 = vector.shape_cast %133 : vector<1x2x128xf32> to vector<2x128xf32>
    %cst_33 = arith.constant dense<0.000000e+00> : vector<2x128xf32>
    %135 = tpu.matmul %112, %8, %cst_33 {dimension_numbers = #tpu.dot_dimension_numbers<[1], [0], [0], [1], [0, 0, 1, 1], [], []>} : vector<2x32xf32>, vector<32x128xf32>, vector<2x128xf32> -> vector<2x128xf32>
    %136 = arith.addf %134, %135 : vector<2x128xf32>
    %137 = arith.negf %136 : vector<2x128xf32>
    %138 = math.exp %137 : vector<2x128xf32>
    %cst_34 = arith.constant 1.000000e+00 : f32
    %139 = vector.broadcast %cst_34 : f32 to vector<2x128xf32>
    %140 = arith.addf %139, %138 : vector<2x128xf32>
    %141 = arith.divf %139, %140 : vector<2x128xf32>
    %142 = math.tanh %136 : vector<2x128xf32>
    %143 = vector.extract_strided_slice %141 {offsets = [0, 0], sizes = [2, 32], strides = [1, 1]} : vector<2x128xf32> to vector<2x32xf32>
    %144 = vector.extract_strided_slice %141 {offsets = [0, 32], sizes = [2, 32], strides = [1, 1]} : vector<2x128xf32> to vector<2x32xf32>
    %145 = vector.extract_strided_slice %141 {offsets = [0, 96], sizes = [2, 32], strides = [1, 1]} : vector<2x128xf32> to vector<2x32xf32>
    %146 = vector.extract_strided_slice %142 {offsets = [0, 64], sizes = [2, 32], strides = [1, 1]} : vector<2x128xf32> to vector<2x32xf32>
    %147 = arith.mulf %144, %110 : vector<2x32xf32>
    %148 = arith.mulf %143, %146 : vector<2x32xf32>
    %149 = arith.addf %147, %148 : vector<2x32xf32>
    %150 = math.tanh %149 : vector<2x32xf32>
    %151 = arith.mulf %145, %150 : vector<2x32xf32>
    %cst_35 = arith.constant dense<0.000000e+00> : vector<2x128xf32>
    %152 = tpu.matmul %151, %9, %cst_35 {dimension_numbers = #tpu.dot_dimension_numbers<[1], [0], [0], [1], [0, 0, 1, 1], [], []>} : vector<2x32xf32>, vector<32x128xf32>, vector<2x128xf32> -> vector<2x128xf32>
    %153 = vector.broadcast %10 : vector<1x128xf32> to vector<2x128xf32>
    %154 = arith.addf %152, %153 : vector<2x128xf32>
    %cst_36 = arith.constant dense<0.000000e+00> : vector<2x128xf32>
    %155 = tpu.matmul %132, %11, %cst_36 {dimension_numbers = #tpu.dot_dimension_numbers<[1], [0], [0], [1], [0, 0, 1, 1], [], []>} : vector<2x32xf32>, vector<32x128xf32>, vector<2x128xf32> -> vector<2x128xf32>
    %156 = arith.addf %154, %155 : vector<2x128xf32>
    %157 = arith.negf %156 : vector<2x128xf32>
    %158 = math.exp %157 : vector<2x128xf32>
    %cst_37 = arith.constant 1.000000e+00 : f32
    %159 = vector.broadcast %cst_37 : f32 to vector<2x128xf32>
    %160 = arith.addf %159, %158 : vector<2x128xf32>
    %161 = arith.divf %159, %160 : vector<2x128xf32>
    %162 = math.tanh %156 : vector<2x128xf32>
    %163 = vector.extract_strided_slice %161 {offsets = [0, 0], sizes = [2, 32], strides = [1, 1]} : vector<2x128xf32> to vector<2x32xf32>
    %164 = vector.extract_strided_slice %161 {offsets = [0, 32], sizes = [2, 32], strides = [1, 1]} : vector<2x128xf32> to vector<2x32xf32>
    %165 = vector.extract_strided_slice %161 {offsets = [0, 96], sizes = [2, 32], strides = [1, 1]} : vector<2x128xf32> to vector<2x32xf32>
    %166 = vector.extract_strided_slice %162 {offsets = [0, 64], sizes = [2, 32], strides = [1, 1]} : vector<2x128xf32> to vector<2x32xf32>
    %167 = arith.mulf %164, %130 : vector<2x32xf32>
    %168 = arith.mulf %163, %166 : vector<2x32xf32>
    %169 = arith.addf %167, %168 : vector<2x32xf32>
    %170 = math.tanh %169 : vector<2x32xf32>
    %171 = arith.mulf %165, %170 : vector<2x32xf32>
    %172 = vector.extract_strided_slice %7 {offsets = [4, 0, 0], sizes = [1, 2, 128], strides = [1, 1, 1]} : vector<8x2x128xf32> to vector<1x2x128xf32>
    %173 = vector.shape_cast %172 : vector<1x2x128xf32> to vector<2x128xf32>
    %cst_38 = arith.constant dense<0.000000e+00> : vector<2x128xf32>
    %174 = tpu.matmul %151, %8, %cst_38 {dimension_numbers = #tpu.dot_dimension_numbers<[1], [0], [0], [1], [0, 0, 1, 1], [], []>} : vector<2x32xf32>, vector<32x128xf32>, vector<2x128xf32> -> vector<2x128xf32>
    %175 = arith.addf %173, %174 : vector<2x128xf32>
    %176 = arith.negf %175 : vector<2x128xf32>
    %177 = math.exp %176 : vector<2x128xf32>
    %cst_39 = arith.constant 1.000000e+00 : f32
    %178 = vector.broadcast %cst_39 : f32 to vector<2x128xf32>
    %179 = arith.addf %178, %177 : vector<2x128xf32>
    %180 = arith.divf %178, %179 : vector<2x128xf32>
    %181 = math.tanh %175 : vector<2x128xf32>
    %182 = vector.extract_strided_slice %180 {offsets = [0, 0], sizes = [2, 32], strides = [1, 1]} : vector<2x128xf32> to vector<2x32xf32>
    %183 = vector.extract_strided_slice %180 {offsets = [0, 32], sizes = [2, 32], strides = [1, 1]} : vector<2x128xf32> to vector<2x32xf32>
    %184 = vector.extract_strided_slice %180 {offsets = [0, 96], sizes = [2, 32], strides = [1, 1]} : vector<2x128xf32> to vector<2x32xf32>
    %185 = vector.extract_strided_slice %181 {offsets = [0, 64], sizes = [2, 32], strides = [1, 1]} : vector<2x128xf32> to vector<2x32xf32>
    %186 = arith.mulf %183, %149 : vector<2x32xf32>
    %187 = arith.mulf %182, %185 : vector<2x32xf32>
    %188 = arith.addf %186, %187 : vector<2x32xf32>
    %189 = math.tanh %188 : vector<2x32xf32>
    %190 = arith.mulf %184, %189 : vector<2x32xf32>
    %cst_40 = arith.constant dense<0.000000e+00> : vector<2x128xf32>
    %191 = tpu.matmul %190, %9, %cst_40 {dimension_numbers = #tpu.dot_dimension_numbers<[1], [0], [0], [1], [0, 0, 1, 1], [], []>} : vector<2x32xf32>, vector<32x128xf32>, vector<2x128xf32> -> vector<2x128xf32>
    %192 = vector.broadcast %10 : vector<1x128xf32> to vector<2x128xf32>
    %193 = arith.addf %191, %192 : vector<2x128xf32>
    %cst_41 = arith.constant dense<0.000000e+00> : vector<2x128xf32>
    %194 = tpu.matmul %171, %11, %cst_41 {dimension_numbers = #tpu.dot_dimension_numbers<[1], [0], [0], [1], [0, 0, 1, 1], [], []>} : vector<2x32xf32>, vector<32x128xf32>, vector<2x128xf32> -> vector<2x128xf32>
    %195 = arith.addf %193, %194 : vector<2x128xf32>
    %196 = arith.negf %195 : vector<2x128xf32>
    %197 = math.exp %196 : vector<2x128xf32>
    %cst_42 = arith.constant 1.000000e+00 : f32
    %198 = vector.broadcast %cst_42 : f32 to vector<2x128xf32>
    %199 = arith.addf %198, %197 : vector<2x128xf32>
    %200 = arith.divf %198, %199 : vector<2x128xf32>
    %201 = math.tanh %195 : vector<2x128xf32>
    %202 = vector.extract_strided_slice %200 {offsets = [0, 0], sizes = [2, 32], strides = [1, 1]} : vector<2x128xf32> to vector<2x32xf32>
    %203 = vector.extract_strided_slice %200 {offsets = [0, 32], sizes = [2, 32], strides = [1, 1]} : vector<2x128xf32> to vector<2x32xf32>
    %204 = vector.extract_strided_slice %200 {offsets = [0, 96], sizes = [2, 32], strides = [1, 1]} : vector<2x128xf32> to vector<2x32xf32>
    %205 = vector.extract_strided_slice %201 {offsets = [0, 64], sizes = [2, 32], strides = [1, 1]} : vector<2x128xf32> to vector<2x32xf32>
    %206 = arith.mulf %203, %169 : vector<2x32xf32>
    %207 = arith.mulf %202, %205 : vector<2x32xf32>
    %208 = arith.addf %206, %207 : vector<2x32xf32>
    %209 = math.tanh %208 : vector<2x32xf32>
    %210 = arith.mulf %204, %209 : vector<2x32xf32>
    %211 = vector.extract_strided_slice %7 {offsets = [5, 0, 0], sizes = [1, 2, 128], strides = [1, 1, 1]} : vector<8x2x128xf32> to vector<1x2x128xf32>
    %212 = vector.shape_cast %211 : vector<1x2x128xf32> to vector<2x128xf32>
    %cst_43 = arith.constant dense<0.000000e+00> : vector<2x128xf32>
    %213 = tpu.matmul %190, %8, %cst_43 {dimension_numbers = #tpu.dot_dimension_numbers<[1], [0], [0], [1], [0, 0, 1, 1], [], []>} : vector<2x32xf32>, vector<32x128xf32>, vector<2x128xf32> -> vector<2x128xf32>
    %214 = arith.addf %212, %213 : vector<2x128xf32>
    %215 = arith.negf %214 : vector<2x128xf32>
    %216 = math.exp %215 : vector<2x128xf32>
    %cst_44 = arith.constant 1.000000e+00 : f32
    %217 = vector.broadcast %cst_44 : f32 to vector<2x128xf32>
    %218 = arith.addf %217, %216 : vector<2x128xf32>
    %219 = arith.divf %217, %218 : vector<2x128xf32>
    %220 = math.tanh %214 : vector<2x128xf32>
    %221 = vector.extract_strided_slice %219 {offsets = [0, 0], sizes = [2, 32], strides = [1, 1]} : vector<2x128xf32> to vector<2x32xf32>
    %222 = vector.extract_strided_slice %219 {offsets = [0, 32], sizes = [2, 32], strides = [1, 1]} : vector<2x128xf32> to vector<2x32xf32>
    %223 = vector.extract_strided_slice %219 {offsets = [0, 96], sizes = [2, 32], strides = [1, 1]} : vector<2x128xf32> to vector<2x32xf32>
    %224 = vector.extract_strided_slice %220 {offsets = [0, 64], sizes = [2, 32], strides = [1, 1]} : vector<2x128xf32> to vector<2x32xf32>
    %225 = arith.mulf %222, %188 : vector<2x32xf32>
    %226 = arith.mulf %221, %224 : vector<2x32xf32>
    %227 = arith.addf %225, %226 : vector<2x32xf32>
    %228 = math.tanh %227 : vector<2x32xf32>
    %229 = arith.mulf %223, %228 : vector<2x32xf32>
    %cst_45 = arith.constant dense<0.000000e+00> : vector<2x128xf32>
    %230 = tpu.matmul %229, %9, %cst_45 {dimension_numbers = #tpu.dot_dimension_numbers<[1], [0], [0], [1], [0, 0, 1, 1], [], []>} : vector<2x32xf32>, vector<32x128xf32>, vector<2x128xf32> -> vector<2x128xf32>
    %231 = vector.broadcast %10 : vector<1x128xf32> to vector<2x128xf32>
    %232 = arith.addf %230, %231 : vector<2x128xf32>
    %cst_46 = arith.constant dense<0.000000e+00> : vector<2x128xf32>
    %233 = tpu.matmul %210, %11, %cst_46 {dimension_numbers = #tpu.dot_dimension_numbers<[1], [0], [0], [1], [0, 0, 1, 1], [], []>} : vector<2x32xf32>, vector<32x128xf32>, vector<2x128xf32> -> vector<2x128xf32>
    %234 = arith.addf %232, %233 : vector<2x128xf32>
    %235 = arith.negf %234 : vector<2x128xf32>
    %236 = math.exp %235 : vector<2x128xf32>
    %cst_47 = arith.constant 1.000000e+00 : f32
    %237 = vector.broadcast %cst_47 : f32 to vector<2x128xf32>
    %238 = arith.addf %237, %236 : vector<2x128xf32>
    %239 = arith.divf %237, %238 : vector<2x128xf32>
    %240 = math.tanh %234 : vector<2x128xf32>
    %241 = vector.extract_strided_slice %239 {offsets = [0, 0], sizes = [2, 32], strides = [1, 1]} : vector<2x128xf32> to vector<2x32xf32>
    %242 = vector.extract_strided_slice %239 {offsets = [0, 32], sizes = [2, 32], strides = [1, 1]} : vector<2x128xf32> to vector<2x32xf32>
    %243 = vector.extract_strided_slice %239 {offsets = [0, 96], sizes = [2, 32], strides = [1, 1]} : vector<2x128xf32> to vector<2x32xf32>
    %244 = vector.extract_strided_slice %240 {offsets = [0, 64], sizes = [2, 32], strides = [1, 1]} : vector<2x128xf32> to vector<2x32xf32>
    %245 = arith.mulf %242, %208 : vector<2x32xf32>
    %246 = arith.mulf %241, %244 : vector<2x32xf32>
    %247 = arith.addf %245, %246 : vector<2x32xf32>
    %248 = math.tanh %247 : vector<2x32xf32>
    %249 = arith.mulf %243, %248 : vector<2x32xf32>
    %250 = vector.extract_strided_slice %7 {offsets = [6, 0, 0], sizes = [1, 2, 128], strides = [1, 1, 1]} : vector<8x2x128xf32> to vector<1x2x128xf32>
    %251 = vector.shape_cast %250 : vector<1x2x128xf32> to vector<2x128xf32>
    %cst_48 = arith.constant dense<0.000000e+00> : vector<2x128xf32>
    %252 = tpu.matmul %229, %8, %cst_48 {dimension_numbers = #tpu.dot_dimension_numbers<[1], [0], [0], [1], [0, 0, 1, 1], [], []>} : vector<2x32xf32>, vector<32x128xf32>, vector<2x128xf32> -> vector<2x128xf32>
    %253 = arith.addf %251, %252 : vector<2x128xf32>
    %254 = arith.negf %253 : vector<2x128xf32>
    %255 = math.exp %254 : vector<2x128xf32>
    %cst_49 = arith.constant 1.000000e+00 : f32
    %256 = vector.broadcast %cst_49 : f32 to vector<2x128xf32>
    %257 = arith.addf %256, %255 : vector<2x128xf32>
    %258 = arith.divf %256, %257 : vector<2x128xf32>
    %259 = math.tanh %253 : vector<2x128xf32>
    %260 = vector.extract_strided_slice %258 {offsets = [0, 0], sizes = [2, 32], strides = [1, 1]} : vector<2x128xf32> to vector<2x32xf32>
    %261 = vector.extract_strided_slice %258 {offsets = [0, 32], sizes = [2, 32], strides = [1, 1]} : vector<2x128xf32> to vector<2x32xf32>
    %262 = vector.extract_strided_slice %258 {offsets = [0, 96], sizes = [2, 32], strides = [1, 1]} : vector<2x128xf32> to vector<2x32xf32>
    %263 = vector.extract_strided_slice %259 {offsets = [0, 64], sizes = [2, 32], strides = [1, 1]} : vector<2x128xf32> to vector<2x32xf32>
    %264 = arith.mulf %261, %227 : vector<2x32xf32>
    %265 = arith.mulf %260, %263 : vector<2x32xf32>
    %266 = arith.addf %264, %265 : vector<2x32xf32>
    %267 = math.tanh %266 : vector<2x32xf32>
    %268 = arith.mulf %262, %267 : vector<2x32xf32>
    %cst_50 = arith.constant dense<0.000000e+00> : vector<2x128xf32>
    %269 = tpu.matmul %268, %9, %cst_50 {dimension_numbers = #tpu.dot_dimension_numbers<[1], [0], [0], [1], [0, 0, 1, 1], [], []>} : vector<2x32xf32>, vector<32x128xf32>, vector<2x128xf32> -> vector<2x128xf32>
    %270 = vector.broadcast %10 : vector<1x128xf32> to vector<2x128xf32>
    %271 = arith.addf %269, %270 : vector<2x128xf32>
    %cst_51 = arith.constant dense<0.000000e+00> : vector<2x128xf32>
    %272 = tpu.matmul %249, %11, %cst_51 {dimension_numbers = #tpu.dot_dimension_numbers<[1], [0], [0], [1], [0, 0, 1, 1], [], []>} : vector<2x32xf32>, vector<32x128xf32>, vector<2x128xf32> -> vector<2x128xf32>
    %273 = arith.addf %271, %272 : vector<2x128xf32>
    %274 = arith.negf %273 : vector<2x128xf32>
    %275 = math.exp %274 : vector<2x128xf32>
    %cst_52 = arith.constant 1.000000e+00 : f32
    %276 = vector.broadcast %cst_52 : f32 to vector<2x128xf32>
    %277 = arith.addf %276, %275 : vector<2x128xf32>
    %278 = arith.divf %276, %277 : vector<2x128xf32>
    %279 = math.tanh %273 : vector<2x128xf32>
    %280 = vector.extract_strided_slice %278 {offsets = [0, 0], sizes = [2, 32], strides = [1, 1]} : vector<2x128xf32> to vector<2x32xf32>
    %281 = vector.extract_strided_slice %278 {offsets = [0, 32], sizes = [2, 32], strides = [1, 1]} : vector<2x128xf32> to vector<2x32xf32>
    %282 = vector.extract_strided_slice %278 {offsets = [0, 96], sizes = [2, 32], strides = [1, 1]} : vector<2x128xf32> to vector<2x32xf32>
    %283 = vector.extract_strided_slice %279 {offsets = [0, 64], sizes = [2, 32], strides = [1, 1]} : vector<2x128xf32> to vector<2x32xf32>
    %284 = arith.mulf %281, %247 : vector<2x32xf32>
    %285 = arith.mulf %280, %283 : vector<2x32xf32>
    %286 = arith.addf %284, %285 : vector<2x32xf32>
    %287 = math.tanh %286 : vector<2x32xf32>
    %288 = arith.mulf %282, %287 : vector<2x32xf32>
    %289 = vector.extract_strided_slice %7 {offsets = [7, 0, 0], sizes = [1, 2, 128], strides = [1, 1, 1]} : vector<8x2x128xf32> to vector<1x2x128xf32>
    %290 = vector.shape_cast %289 : vector<1x2x128xf32> to vector<2x128xf32>
    %cst_53 = arith.constant dense<0.000000e+00> : vector<2x128xf32>
    %291 = tpu.matmul %268, %8, %cst_53 {dimension_numbers = #tpu.dot_dimension_numbers<[1], [0], [0], [1], [0, 0, 1, 1], [], []>} : vector<2x32xf32>, vector<32x128xf32>, vector<2x128xf32> -> vector<2x128xf32>
    %292 = arith.addf %290, %291 : vector<2x128xf32>
    %293 = arith.negf %292 : vector<2x128xf32>
    %294 = math.exp %293 : vector<2x128xf32>
    %cst_54 = arith.constant 1.000000e+00 : f32
    %295 = vector.broadcast %cst_54 : f32 to vector<2x128xf32>
    %296 = arith.addf %295, %294 : vector<2x128xf32>
    %297 = arith.divf %295, %296 : vector<2x128xf32>
    %298 = math.tanh %292 : vector<2x128xf32>
    %299 = vector.extract_strided_slice %297 {offsets = [0, 0], sizes = [2, 32], strides = [1, 1]} : vector<2x128xf32> to vector<2x32xf32>
    %300 = vector.extract_strided_slice %297 {offsets = [0, 32], sizes = [2, 32], strides = [1, 1]} : vector<2x128xf32> to vector<2x32xf32>
    %301 = vector.extract_strided_slice %297 {offsets = [0, 96], sizes = [2, 32], strides = [1, 1]} : vector<2x128xf32> to vector<2x32xf32>
    %302 = vector.extract_strided_slice %298 {offsets = [0, 64], sizes = [2, 32], strides = [1, 1]} : vector<2x128xf32> to vector<2x32xf32>
    %303 = arith.mulf %300, %266 : vector<2x32xf32>
    %304 = arith.mulf %299, %302 : vector<2x32xf32>
    %305 = arith.addf %303, %304 : vector<2x32xf32>
    %306 = math.tanh %305 : vector<2x32xf32>
    %307 = arith.mulf %301, %306 : vector<2x32xf32>
    %cst_55 = arith.constant dense<0.000000e+00> : vector<2x128xf32>
    %308 = tpu.matmul %307, %9, %cst_55 {dimension_numbers = #tpu.dot_dimension_numbers<[1], [0], [0], [1], [0, 0, 1, 1], [], []>} : vector<2x32xf32>, vector<32x128xf32>, vector<2x128xf32> -> vector<2x128xf32>
    %309 = vector.broadcast %10 : vector<1x128xf32> to vector<2x128xf32>
    %310 = arith.addf %308, %309 : vector<2x128xf32>
    %cst_56 = arith.constant dense<0.000000e+00> : vector<2x128xf32>
    %311 = tpu.matmul %288, %11, %cst_56 {dimension_numbers = #tpu.dot_dimension_numbers<[1], [0], [0], [1], [0, 0, 1, 1], [], []>} : vector<2x32xf32>, vector<32x128xf32>, vector<2x128xf32> -> vector<2x128xf32>
    %312 = arith.addf %310, %311 : vector<2x128xf32>
    %313 = arith.negf %312 : vector<2x128xf32>
    %314 = math.exp %313 : vector<2x128xf32>
    %cst_57 = arith.constant 1.000000e+00 : f32
    %315 = vector.broadcast %cst_57 : f32 to vector<2x128xf32>
    %316 = arith.addf %315, %314 : vector<2x128xf32>
    %317 = arith.divf %315, %316 : vector<2x128xf32>
    %318 = math.tanh %312 : vector<2x128xf32>
    %319 = vector.extract_strided_slice %317 {offsets = [0, 0], sizes = [2, 32], strides = [1, 1]} : vector<2x128xf32> to vector<2x32xf32>
    %320 = vector.extract_strided_slice %317 {offsets = [0, 32], sizes = [2, 32], strides = [1, 1]} : vector<2x128xf32> to vector<2x32xf32>
    %321 = vector.extract_strided_slice %317 {offsets = [0, 96], sizes = [2, 32], strides = [1, 1]} : vector<2x128xf32> to vector<2x32xf32>
    %322 = vector.extract_strided_slice %318 {offsets = [0, 64], sizes = [2, 32], strides = [1, 1]} : vector<2x128xf32> to vector<2x32xf32>
    %323 = arith.mulf %320, %286 : vector<2x32xf32>
    %324 = arith.mulf %319, %322 : vector<2x32xf32>
    %325 = arith.addf %323, %324 : vector<2x32xf32>
    %326 = math.tanh %325 : vector<2x32xf32>
    %327 = arith.mulf %321, %326 : vector<2x32xf32>
    %328 = vector.shape_cast %54 : vector<2x32xf32> to vector<2x1x32xf32>
    %329 = vector.shape_cast %93 : vector<2x32xf32> to vector<2x1x32xf32>
    %330 = vector.shape_cast %132 : vector<2x32xf32> to vector<2x1x32xf32>
    %331 = vector.shape_cast %171 : vector<2x32xf32> to vector<2x1x32xf32>
    %332 = vector.shape_cast %210 : vector<2x32xf32> to vector<2x1x32xf32>
    %333 = vector.shape_cast %249 : vector<2x32xf32> to vector<2x1x32xf32>
    %334 = vector.shape_cast %288 : vector<2x32xf32> to vector<2x1x32xf32>
    %335 = vector.shape_cast %327 : vector<2x32xf32> to vector<2x1x32xf32>
    %336 = tpu.concatenate %328, %329, %330, %331, %332, %333, %334, %335 in 1 : vector<2x1x32xf32>, vector<2x1x32xf32>, vector<2x1x32xf32>, vector<2x1x32xf32>, vector<2x1x32xf32>, vector<2x1x32xf32>, vector<2x1x32xf32>, vector<2x1x32xf32> -> vector<2x8x32xf32>
    %337 = vector.shape_cast %336 : vector<2x8x32xf32> to vector<16x32xf32>
    %c0_58 = arith.constant 0 : index
    %c0_59 = arith.constant 0 : index
    %338 = vector.load %arg8[%c0_58, %c0_59] : memref<32x64xf32, #tpu.memory_space<vmem>>, vector<32x64xf32>
    %cst_60 = arith.constant dense<0.000000e+00> : vector<16x64xf32>
    %339 = tpu.matmul %337, %338, %cst_60 {dimension_numbers = #tpu.dot_dimension_numbers<[1], [0], [0], [1], [0, 0, 1, 1], [], []>} : vector<16x32xf32>, vector<32x64xf32>, vector<16x64xf32> -> vector<16x64xf32>
    %c0_61 = arith.constant 0 : index
    %c0_62 = arith.constant 0 : index
    %340 = vector.load %arg9[%c0_61, %c0_62] : memref<1x64xf32, #tpu.memory_space<vmem>>, vector<1x64xf32>
    %341 = vector.broadcast %340 : vector<1x64xf32> to vector<16x64xf32>
    %342 = arith.addf %339, %341 : vector<16x64xf32>
    %343 = math.tanh %342 : vector<16x64xf32>
    %344 = vector.shape_cast %343 : vector<16x64xf32> to vector<2x8x64xf32>
    %c0_63 = arith.constant 0 : index
    %c0_64 = arith.constant 0 : index
    %345 = vector.load %arg10[%c0_63, %c0_64] : memref<1x64xf32, #tpu.memory_space<vmem>>, vector<1x64xf32>
    %346 = vector.shape_cast %345 : vector<1x64xf32> to vector<1x1x64xf32>
    %347 = vector.broadcast %346 : vector<1x1x64xf32> to vector<2x8x64xf32>
    %348 = arith.mulf %344, %347 : vector<2x8x64xf32>
    %cst_65 = arith.constant dense<0.000000e+00> : vector<2x8xf32>
    %349 = vector.multi_reduction <add>, %348, %cst_65 [2] : vector<2x8x64xf32> to vector<2x8xf32>
    %c0_66 = arith.constant 0 : index
    %c0_67 = arith.constant 0 : index
    %350 = vector.load %arg11[%c0_66, %c0_67] : memref<1x1xf32, #tpu.memory_space<vmem>>, vector<1x1xf32>
    %351 = vector.broadcast %350 : vector<1x1xf32> to vector<2x8xf32>
    %352 = arith.addf %349, %351 : vector<2x8xf32>
    %cst_68 = arith.constant dense<0xFF800000> : vector<2xf32>
    %353 = vector.multi_reduction <maximumf>, %352, %cst_68 [1] : vector<2x8xf32> to vector<2xf32>
    %354 = vector.shape_cast %353 : vector<2xf32> to vector<2x1xf32>
    %355 = vector.broadcast %354 : vector<2x1xf32> to vector<2x8xf32>
    %356 = arith.subf %352, %355 : vector<2x8xf32>
    %357 = math.exp %356 : vector<2x8xf32>
    %cst_69 = arith.constant dense<0.000000e+00> : vector<2xf32>
    %358 = vector.multi_reduction <add>, %357, %cst_69 [1] : vector<2x8xf32> to vector<2xf32>
    %359 = vector.shape_cast %358 : vector<2xf32> to vector<2x1xf32>
    %360 = vector.broadcast %359 : vector<2x1xf32> to vector<2x8xf32>
    %361 = arith.divf %357, %360 : vector<2x8xf32>
    %362 = vector.shape_cast %361 : vector<2x8xf32> to vector<2x8x1xf32>
    %363 = vector.broadcast %362 : vector<2x8x1xf32> to vector<2x8x32xf32>
    %364 = arith.mulf %363, %336 : vector<2x8x32xf32>
    %cst_70 = arith.constant dense<0.000000e+00> : vector<2x32xf32>
    %365 = vector.multi_reduction <add>, %364, %cst_70 [1] : vector<2x8x32xf32> to vector<2x32xf32>
    %c0_71 = arith.constant 0 : index
    %c0_72 = arith.constant 0 : index
    %366 = vector.load %arg12[%c0_71, %c0_72] : memref<1x32xf32, #tpu.memory_space<vmem>>, vector<1x32xf32>
    %367 = vector.broadcast %366 : vector<1x32xf32> to vector<2x32xf32>
    %368 = arith.mulf %365, %367 : vector<2x32xf32>
    %cst_73 = arith.constant dense<0.000000e+00> : vector<2xf32>
    %369 = vector.multi_reduction <add>, %368, %cst_73 [1] : vector<2x32xf32> to vector<2xf32>
    %370 = vector.shape_cast %369 : vector<2xf32> to vector<2x1xf32>
    %c0_74 = arith.constant 0 : index
    %c0_75 = arith.constant 0 : index
    %371 = vector.load %arg13[%c0_74, %c0_75] : memref<1x1xf32, #tpu.memory_space<vmem>>, vector<1x1xf32>
    %372 = vector.broadcast %371 : vector<1x1xf32> to vector<2x1xf32>
    %373 = arith.addf %370, %372 : vector<2x1xf32>
    %374 = arith.negf %373 : vector<2x1xf32>
    %375 = math.exp %374 : vector<2x1xf32>
    %cst_76 = arith.constant 1.000000e+00 : f32
    %376 = vector.broadcast %cst_76 : f32 to vector<2x1xf32>
    %377 = arith.addf %376, %375 : vector<2x1xf32>
    %378 = arith.divf %376, %377 : vector<2x1xf32>
    %c0_77 = arith.constant 0 : index
    %c0_78 = arith.constant 0 : index
    %379 = vector.load %arg14[%c0_77, %c0_78] : memref<2x1xf32, #tpu.memory_space<vmem>>, vector<2x1xf32>
    tpu.vector_store %arg14[%c0_77, %c0_78], %378 {strides = array<i32>} : memref<2x1xf32, #tpu.memory_space<vmem>>, vector<2x1xf32>,
    return
  }
  func.func @transform_0(%arg0: i32) -> (i32, i32, i32) {
    %c0_i32 = arith.constant 0 : i32
    %c0_i32_0 = arith.constant 0 : i32
    %c0_i32_1 = arith.constant 0 : i32
    return %c0_i32, %arg0, %c0_i32_0 : i32, i32, i32
  }
  func.func @transform_1(%arg0: i32) -> (i32, i32) {
    %c0_i32 = arith.constant 0 : i32
    %c0_i32_0 = arith.constant 0 : i32
    %c0_i32_1 = arith.constant 0 : i32
    return %c0_i32, %c0_i32_0 : i32, i32
  }
  func.func @transform_2(%arg0: i32) -> (i32, i32) {
    %c0_i32 = arith.constant 0 : i32
    %c0_i32_0 = arith.constant 0 : i32
    %c0_i32_1 = arith.constant 0 : i32
    return %c0_i32, %c0_i32_0 : i32, i32
  }
  func.func @transform_3(%arg0: i32) -> (i32, i32) {
    %c0_i32 = arith.constant 0 : i32
    %c0_i32_0 = arith.constant 0 : i32
    %c0_i32_1 = arith.constant 0 : i32
    return %c0_i32, %c0_i32_0 : i32, i32
  }
  func.func @transform_4(%arg0: i32) -> (i32, i32) {
    %c0_i32 = arith.constant 0 : i32
    %c0_i32_0 = arith.constant 0 : i32
    %c0_i32_1 = arith.constant 0 : i32
    return %c0_i32, %c0_i32_0 : i32, i32
  }
  func.func @transform_5(%arg0: i32) -> (i32, i32) {
    %c0_i32 = arith.constant 0 : i32
    %c0_i32_0 = arith.constant 0 : i32
    %c0_i32_1 = arith.constant 0 : i32
    return %c0_i32, %c0_i32_0 : i32, i32
  }
  func.func @transform_6(%arg0: i32) -> (i32, i32) {
    %c0_i32 = arith.constant 0 : i32
    %c0_i32_0 = arith.constant 0 : i32
    %c0_i32_1 = arith.constant 0 : i32
    return %c0_i32, %c0_i32_0 : i32, i32
  }
  func.func @transform_7(%arg0: i32) -> (i32, i32) {
    %c0_i32 = arith.constant 0 : i32
    %c0_i32_0 = arith.constant 0 : i32
    %c0_i32_1 = arith.constant 0 : i32
    return %c0_i32, %c0_i32_0 : i32, i32
  }
  func.func @transform_8(%arg0: i32) -> (i32, i32) {
    %c0_i32 = arith.constant 0 : i32
    %c0_i32_0 = arith.constant 0 : i32
    %c0_i32_1 = arith.constant 0 : i32
    return %c0_i32, %c0_i32_0 : i32, i32
  }
  func.func @transform_9(%arg0: i32) -> (i32, i32) {
    %c0_i32 = arith.constant 0 : i32
    %c0_i32_0 = arith.constant 0 : i32
    %c0_i32_1 = arith.constant 0 : i32
    return %c0_i32, %c0_i32_0 : i32, i32
  }
  func.func @transform_10(%arg0: i32) -> (i32, i32) {
    %c0_i32 = arith.constant 0 : i32
    %c0_i32_0 = arith.constant 0 : i32
    %c0_i32_1 = arith.constant 0 : i32
    return %c0_i32, %c0_i32_0 : i32, i32
  }
  func.func @transform_11(%arg0: i32) -> (i32, i32) {
    %c0_i32 = arith.constant 0 : i32
    %c0_i32_0 = arith.constant 0 : i32
    %c0_i32_1 = arith.constant 0 : i32
    return %c0_i32, %c0_i32_0 : i32, i32
  }
  func.func @transform_12(%arg0: i32) -> (i32, i32) {
    %c0_i32 = arith.constant 0 : i32
    %c0_i32_0 = arith.constant 0 : i32
    %c0_i32_1 = arith.constant 0 : i32
    return %c0_i32, %c0_i32_0 : i32, i32
  }
  func.func @transform_13(%arg0: i32) -> (i32, i32) {
    %c0_i32 = arith.constant 0 : i32
    %c0_i32_0 = arith.constant 0 : i32
    return %arg0, %c0_i32 : i32, i32
  }
}

</mosaic_0001>

<bundles_post_ra>
// kernel: tpu_custom_call.1
= control target key start
LH: loop header
LB: loop body
LE: loop exit
PB: predicated region body
PF: predicated region fallthrough
CT: control target
= control target key end

     0   :  { %s4676_s0 = inlined_call_operand.hbm [shape: f32[8,2,36], index: 0, kind: input, shape index: {}]   ;;  %s4677_s1 = inlined_call_operand.hbm [shape: f32[36,128], index: 1, kind: input, shape index: {}]   ;;  %s4678_s2 = inlined_call_operand.vmem [shape: f32[1,128], index: 2, kind: input, shape index: {}]   ;;  %s4679_s3 = inlined_call_operand.hbm [shape: f32[32,128], index: 3, kind: input, shape index: {}]   ;;  %s4680_s4 = inlined_call_operand.hbm [shape: f32[32,128], index: 4, kind: input, shape index: {}]   ;;  %s4681_s5 = inlined_call_operand.vmem [shape: f32[1,128], index: 5, kind: input, shape index: {}]   ;;  %s4682_s6 = inlined_call_operand.hbm [shape: f32[32,128], index: 6, kind: input, shape index: {}]   ;;  %s4683_s7 = inlined_call_operand.vmem [shape: f32[32,64], index: 7, kind: input, shape index: {}]   ;;  %s4684_s8 = inlined_call_operand.vmem [shape: f32[1,64], index: 8, kind: input, shape index: {}]   ;;  %s4685_s9 = inlined_call_operand.vmem [shape: f32[1,64], index: 9, kind: input, shape index: {}]   ;;  %s4686_s10 = inlined_call_operand.<no memory space> [shape: f32[1,1], index: 10, kind: input, shape index: {}]   ;;  %s4687_s11 = inlined_call_operand.vmem [shape: f32[1,32], index: 11, kind: input, shape index: {}]   ;;  %s4688_s13 = inlined_call_operand.vmem [shape: f32[2,1], index: 13, kind: output, shape index: {}]   ;;  %s4689_s12 = inlined_call_operand.<no memory space> [shape: f32[1,1], index: 12, kind: input, shape index: {}]  }
   0x1   :  { %v18_v0 = vstv %s4686_s10  ;;  %v20_v1 = vstv %s4689_s12 }
   0x2   :  { %19 = vst [vmem:[#allocation2] sm:$0x1] %v18_v0  ;;  %21 = vst [vmem:[#allocation3] sm:$0x1] %v20_v1 }
   0x3   :  { %22 = vsyncpa [#allocation5], 0 }
   0x4   :  { %23 = vsyncpa [#allocation7], 0 }
   0x5   :  { %24 = vsyncpa [#allocation10], 0  ;;  %s4015_s29 = smov [#allocation6]   ;;  %s3899_s16 = scalar_lea.hbm %s4677_s1, 640 }
   0x6   :  { %s42_s30 = sshll.u32 %s4015_s29, 4  ;;  %p3900_p0 = scmp.ne.s32.totalorder %s4677_s1, %s3899_s16  ;;  %s43_s30 = int_to_ptr.vmem [resolvable:$true] %s42_s30 }
   0x7   :  { %p3903_p1 = scmp.lt.u32.totalorder %s3899_s16, %s4677_s1 }
   0x9   :  { %p3905_p2 = pnand %p3903_p1, %p3900_p0 }
   0xb   :  { %3908 = shalt.err (!%p3905_p2)
}
   0xc   :  { %s3909_s12 = scalar_lea.vmem %s43_s30, 640  ;;  %p3914_p4 = scmp.lt.s32.totalorder %s43_s30, %s43_s30 }
   0xd   :  { %p3910_p3 = scmp.ne.s32.totalorder %s43_s30, %s3909_s12  ;;  %p3915_p5 = scmp.lt.s32.totalorder %s3909_s12, %s3909_s12 }
   0xf   :  { %p3916_p6 = por %p3915_p5, %p3914_p4 }
  0x11   :  { %p3917_p7 = pnand %p3916_p6, %p3910_p3 }
  0x13   :  { %3920 = shalt.err (!%p3917_p7)
}
  0x14   :  { %s4016_s20 = smov 128   ;;  %s4017_s21 = smov 8  }
  0x15   :  { %48 = dma.hbm_to_vmem [thread:$0]  %s4677_s1, 640, %s43_s30, [#allocation7], %s4016_s20, %s4016_s20, %s4017_s21  }
  0x16   :  { %s4018_s24 = smov [#allocation9]   ;;  %s4019_s26 = smov [#allocation4]  }
  0x17   :  { %s68_s25 = sshll.u32 %s4018_s24, 4  ;;  %s30_s27 = sshll.u32 %s4019_s26, 4  ;;  %s69_s25 = int_to_ptr.vmem [resolvable:$true] %s68_s25  ;;  %s31_s27 = int_to_ptr.vmem [resolvable:$true] %s30_s27 }
  0x18   :  { %s3921_s14 = scalar_lea.hbm %s4680_s4, 512 }
  0x19   :  { %p3922_p8 = scmp.ne.s32.totalorder %s4680_s4, %s3921_s14  ;;  %p3925_p9 = scmp.lt.u32.totalorder %s3921_s14, %s4680_s4 }
  0x1b   :  { %p3927_p10 = pnand %p3925_p9, %p3922_p8 }
  0x1d   :  { %3930 = shalt.err (!%p3927_p10)
}
  0x1e   :  { %s3931_s1 = scalar_lea.vmem %s69_s25, 512  ;;  %p3936_p12 = scmp.lt.s32.totalorder %s69_s25, %s69_s25 }
  0x1f   :  { %p3932_p11 = scmp.ne.s32.totalorder %s69_s25, %s3931_s1  ;;  %p3937_p13 = scmp.lt.s32.totalorder %s3931_s1, %s3931_s1 }
  0x21   :  { %p3938_p0 = por %p3937_p13, %p3936_p12 }
  0x23   :  { %p3939_p1 = pnand %p3938_p0, %p3932_p11 }
  0x25   :  { %3942 = shalt.err (!%p3939_p1)
}
  0x26   :  { %74 = dma.hbm_to_vmem [thread:$0]  %s4680_s4, 512, %s69_s25, [#allocation10], %s4016_s20, %s4016_s20, %s4017_s21  }
  0x27   :  { %s3943_s22 = scalar_lea.hbm %s4676_s0, 256 }
  0x28   :  { %p3944_p2 = scmp.ne.s32.totalorder %s4676_s0, %s3943_s22  ;;  %p3947_p3 = scmp.lt.u32.totalorder %s3943_s22, %s4676_s0 }
  0x2a   :  { %p3949_p4 = pnand %p3947_p3, %p3944_p2 }
  0x2c   :  { %3952 = shalt.err (!%p3949_p4)
}
  0x2d   :  { %s3953_s29 = scalar_lea.vmem %s31_s27, 256  ;;  %p3958_p6 = scmp.lt.s32.totalorder %s31_s27, %s31_s27 }
  0x2e   :  { %p3954_p5 = scmp.ne.s32.totalorder %s31_s27, %s3953_s29  ;;  %p3959_p7 = scmp.lt.s32.totalorder %s3953_s29, %s3953_s29 }
  0x30   :  { %p3960_p8 = por %p3959_p7, %p3958_p6 }
  0x32   :  { %p3961_p9 = pnand %p3960_p8, %p3954_p5 }
  0x34   :  { %3964 = shalt.err (!%p3961_p9)
}
  0x35   :  { %s4020_s4 = smov 32   ;;  %s4021_s25 = smov 2  }
  0x36   :  { %36 = dma.hbm_to_vmem [thread:$0]  %s4676_s0, 256, %s31_s27, [#allocation5], %s4020_s4, %s4020_s4, %s4021_s25  }
  0x37   :  { %s4022_s16 = smov [#allocation8]   ;;  %s4023_s18 = smov [#allocation11]  }
  0x38   :  { %s56_s17 = sshll.u32 %s4022_s16, 4  ;;  %s82_s1 = sshll.u32 %s4023_s18, 4  ;;  %s57_s17 = int_to_ptr.vmem [resolvable:$true] %s56_s17  ;;  %s83_s1 = int_to_ptr.vmem [resolvable:$true] %s82_s1 }
  0x39   :  { %s3965_s19 = scalar_lea.hbm %s4679_s3, 512 }
  0x3a   :  { %p3966_p10 = scmp.ne.s32.totalorder %s4679_s3, %s3965_s19  ;;  %p3969_p11 = scmp.lt.u32.totalorder %s3965_s19, %s4679_s3 }
  0x3c   :  { %p3971_p12 = pnand %p3969_p11, %p3966_p10 }
  0x3e   :  { %3974 = shalt.err (!%p3971_p12)
}
  0x3f   :  { %s3975_s0 = scalar_lea.vmem %s57_s17, 512  ;;  %p3980_p0 = scmp.lt.s32.totalorder %s57_s17, %s57_s17 }
  0x40   :  { %p3976_p13 = scmp.ne.s32.totalorder %s57_s17, %s3975_s0  ;;  %p3981_p1 = scmp.lt.s32.totalorder %s3975_s0, %s3975_s0 }
  0x42   :  { %p3982_p2 = por %p3981_p1, %p3980_p0 }
  0x44   :  { %p3983_p3 = pnand %p3982_p2, %p3976_p13 }
  0x46   :  { %3986 = shalt.err (!%p3983_p3)
}
  0x47   :  { %62 = dma.hbm_to_vmem [thread:$0]  %s4679_s3, 512, %s57_s17, [#allocation7], %s4016_s20, %s4016_s20, %s4017_s21  }
  0x48   :  { %s3987_s25 = scalar_lea.hbm %s4682_s6, 512 }
  0x49   :  { %p3988_p4 = scmp.ne.s32.totalorder %s4682_s6, %s3987_s25  ;;  %p3991_p5 = scmp.lt.u32.totalorder %s3987_s25, %s4682_s6 }
  0x4b   :  { %p3993_p6 = pnand %p3991_p5, %p3988_p4 }
  0x4d   :  { %3996 = shalt.err (!%p3993_p6)
}
  0x4e   :  { %s3997_s30 = scalar_lea.vmem %s83_s1, 512  ;;  %p4002_p8 = scmp.lt.s32.totalorder %s83_s1, %s83_s1 }
  0x4f   :  { %p3998_p7 = scmp.ne.s32.totalorder %s83_s1, %s3997_s30  ;;  %p4003_p9 = scmp.lt.s32.totalorder %s3997_s30, %s3997_s30 }
  0x51   :  { %p4004_p10 = por %p4003_p9, %p4002_p8 }
  0x53   :  { %p4005_p11 = pnand %p4004_p10, %p3998_p7 }
  0x55   :  { %4008 = shalt.err (!%p4005_p11)
}
  0x56   :  { %88 = dma.hbm_to_vmem [thread:$0]  %s4682_s6, 512, %s83_s1, [#allocation10], %s4016_s20, %s4016_s20, %s4017_s21  }
  0x57   :  { %4009 = dma.done.wait [#allocation5], 256  }
  0x58   :  { %4010 = vsyncadd [#allocation5], 4294967040 }
  0x59   :  { %4011 = dma.done.wait [#allocation7], 1152  }
  0x5a   :  { %4012 = vsyncadd [#allocation7], 4294966144 }
  0x5b   :  { %4013 = dma.done.wait [#allocation10], 1024  }
  0x5c   :  { %4014 = vsyncadd [#allocation10], 4294966272  ;;  %v149_v2 = vlaneseq  ;;  %v4024_v3 = vmov 0.0|0.0   ;;  %v4025_v4 = vmov 1983009808   ;;  %vm4026_vm0 = vmmov 0  }
  0x5d   :  { %3559 = vmatprep.subr.bf16.mxu1 %v4024_v3  ;;  %v147_v5 = vunpack.c.l.s4 %v4025_v4  ;;  %v4027_v6 = vmov 0.0   ;;  %v124_v9 = vld [vmem:[#allocation6] sm:$0xff]  ;;  %v125_v10 = vld [vmem:[#allocation6 + $0x8] sm:$0xff]  ;;  %v126_v11 = vld [vmem:[#allocation6 + $0x10] sm:$0xff]  ;;  %vm183_vm1 = vcmask 1043456   ;;  %vm178_vm2 = vcmask 293888  }
  0x5e   :  { %3284 = vmatprep.mubr.msk.f32.mxu1 %vm4026_vm0, %v4027_v6  ;;  %v4186_v8 = vshrl.u32 %v149_v2, 7  ;;  %v3551_v12 = vpack.c.bf16 %v125_v10, %v124_v9  ;;  %v127_v13 = vld [vmem:[#allocation6 + $0x18] sm:$0xff]  ;;  %v306_v14 = vld [vmem:[#allocation8] sm:$0xff]  ;;  %v307_v15 = vld [vmem:[#allocation8 + $0x8] sm:$0xff]  ;;  %s4028_s21 = smov 64   ;;  %vm319_vm3 = vcmask 261120  }
  0x5f   :  { %v148_v7 = vunpack.c.0.s8 %v147_v5  ;;  %v3555_v17 = vpack.c.bf16 %v127_v13, %v126_v11  ;;  %v4191_v18 = vpack.c.bf16 %v307_v15, %v306_v14  ;;  %v116_v19 = vld [vmem:[#allocation4] sm:$0x3]  ;;  %v117_v20 = vld [vmem:[#allocation4 + $0x2] sm:$0x3]  ;;  %v118_v21 = vld [vmem:[#allocation4 + $0x4] sm:$0x3] }
  0x60   :  { %3552 = vmatprep.subr.bf16.mxu0 %v3551_v12  ;;  %v119_v22 = vld [vmem:[#allocation4 + $0x6] sm:$0x3]  ;;  %v144_v23 = vcombine.low %v116_v19, %v117_v20  ;;  %v120_v24 = vld [vmem:[#allocation4 + $0x8] sm:$0x3]  ;;  %v121_v26 = vld [vmem:[#allocation4 + $0xa] sm:$0x3] }
  0x61   :  { %v4189_v16 = vsub.s32 %v148_v7, %v4186_v8  ;;  %3554 = vmatpush3.bf16.msra.mxu0 %v3551_v12  ;;  %3561 = vmatpush3.bf16.msra.mxu1 %v4191_v18  ;;  %v145_v25 = vcombine.low %v118_v21, %v119_v22  ;;  %v122_v27 = vld [vmem:[#allocation4 + $0xc] sm:$0x3]  ;;  %v123_v28 = vld [vmem:[#allocation4 + $0xe] sm:$0x3]  ;;  %v161_v30 = vcombine.low %v120_v24, %v121_v26  ;;  %v309_v33 = vld [vmem:[#allocation8 + $0x18] sm:$0xff]  ;;  %vm2789_vm4 = vcmask 1040384  }
  0x62   :  { %3556 = vmatprep.subr.bf16.mxu0 %v3555_v17  ;;  %v162_v31 = vcombine.low %v122_v27, %v123_v28  ;;  %3562 = vmatprep.subr.bf16.mxu1 %v4024_v3  ;;  %v308_v32 = vld [vmem:[#allocation8 + $0x10] sm:$0xff]  ;;  %v128_v34 = vld [vmem:[#allocation6 + $0x20] sm:$0xf]  ;;  %v3079_v41 = vld [vmem:[%s4678_s2] ss:$0 sm:$0xff]  ;;  %vm2792_vm5 = vcmask 1041408  }
  0x63   :  { %v152_v29 = vrot.slane %v144_v23, %v4189_v16  ;;  %v159_v35 = vrot.slane %v145_v25, %v4189_v16  ;;  %v4197_v36 = vpack.c.bf16 %v309_v33, %v308_v32  ;;  %v169_v37 = vrot.slane %v161_v30, %v4189_v16  ;;  %v310_v60 = vld [vmem:[#allocation9] sm:$0xff]  ;;  %v311_v61 = vld [vmem:[#allocation9 + $0x8] sm:$0xff]  ;;  %v312_v62 = vld [vmem:[#allocation9 + $0x10] sm:$0xff]  ;;  %s4031_s14 = smov 96  }
  0x64   :  { %v176_v38 = vrot.slane %v162_v31, %v4189_v16  ;;  %v4232_v63 = vpack.c.bf16 %v311_v61, %v310_v60  ;;  %v313_v0 = vld [vmem:[#allocation9 + $0x18] sm:$0xff]  ;;  %v315_v10 = vld [vmem:[#allocation11] sm:$0xff]  ;;  %v316_v11 = vld [vmem:[#allocation11 + $0x8] sm:$0xff]  ;;  %vm2795_vm6 = vcmask 1042432   ;;  %vm2800_vm7 = vcmask 1044480  }
  0x65   :  { %3558 = vmatpush3.bf16.msra.mxu0 %v3555_v17  ;;  %v160_v39 = vcombine.low %v152_v29, %v159_v35  ;;  %3564 = vmatpush3.bf16.msra.mxu1 %v4197_v36  ;;  %v4235_v1 = vpack.c.bf16 %v313_v0, %v312_v62  ;;  %v4243_v12 = vpack.c.bf16 %v316_v11, %v315_v10  ;;  %v317_v13 = vld [vmem:[#allocation11 + $0x10] sm:$0xff]  ;;  %v318_v14 = vld [vmem:[#allocation11 + $0x18] sm:$0xff]  ;;  %v4273_v23 = vld [vmem:[%s4681_s5] ss:$0 sm:$0xff]  ;;  %vm2803_vm8 = vcmask 1045504  }
  0x66   :  { %3271 = vmatprep.subr.msk.mxu0 %vm183_vm1, %v128_v34  ;;  %v177_v40 = vcombine.low %v169_v37, %v176_v38  ;;  %3565 = vmatprep.subr.bf16.mxu1 %v4024_v3  ;;  %v4248_v17 = vpack.c.bf16 %v318_v14, %v317_v13  ;;  %vm2806_vm9 = vcmask 1046528   ;;  %vm2916_vm10 = vcmask 523264  }
  0x67   :  { %3273 = vmatprep.mubr.msk.f32.mxu0 %vm178_vm2, %v160_v39  ;;  %vm2947_vm11 = vcmask 1041409   ;;  %vm2950_vm12 = vcmask 58368   ;;  %vm3019_vm13 = vcmask 1048320   ;;  %vm3052_vm14 = vcmask 254976  }
  0x68   :  { %3285 = vmatmul.mubr.f32.vlgmr.msra.gmra.mrb[0].mxu1 %v4027_v6  ;;  %vm3070_vm15 = vcmask 1024  }
  0x69   :  { %3272 = vmatpush3.msk.msra.mxu0 %vm183_vm1, %v128_v34  ;;  %3295 = vmatprep.mubr.msk.f32.mxu1 %vm4026_vm0, %v4027_v6 }
  0x6a   :  { %3274 = vmatmul.mubr.msk.f32.vlgmr.msra.gmra.mrb[0].mxu0 %vm178_vm2, %v177_v40  ;;  %3577 = vmatprep.subr.bf16.mxu0 %v4024_v3 }
  0x6b   :  { %3579 = vmatpush3.bf16.msra.mxu0 %v4191_v18  ;;  %3317 = vmatprep.mubr.msk.f32.mxu0 %vm4026_vm0, %v4027_v6 }
  0x6c   :  { %3580 = vmatprep.subr.bf16.mxu0 %v4024_v3  ;;  %3567 = vmatpush3.bf16.msra.mxu1 %v4232_v63 }
  0x6d   :  { %3568 = vmatprep.subr.bf16.mxu1 %v4024_v3 }
  0x6f   :  { %3582 = vmatpush3.bf16.msra.mxu0 %v4197_v36 }
  0x70   :  { %3583 = vmatprep.subr.bf16.mxu0 %v4024_v3  ;;  %3570 = vmatpush3.bf16.msra.mxu1 %v4235_v1 }
  0x71   :  { %3571 = vmatprep.subr.bf16.mxu1 %v4024_v3 }
 0x13b   :  { %v389_v42 = vpop.f32.mrb[0].mxu1 }
 0x13c   :  { %v3286_v43 = vpop.f32.mrb[1].mxu1 }
 0x13d   :  { %v3275_v44 = vpop.f32.mrb[0].mxu0 }
 0x13e   :  { %v4218_v45 = vadd.f32 %v3275_v44, %v3079_v41  ;;  %v253_v46 = vpop.f32.mrb[1].mxu0 }
 0x13f   :  { %v4220_v47 = vadd.f32 %v3079_v41, %v253_v46 }
 0x141   :  { %v4224_v48 = vrot.slane %v4220_v47, %v4189_v16 }
 0x143   :  { %v393_v49 = vadd.f32 %v389_v42, %v4224_v48  ;;  %v279_v19 = vcombine.high %v4224_v48, %v4224_v48 }
 0x145   :  { %3754 = vtanh.f32 %v393_v49  ;;  %v3083_v51 = vmul.f32 -1.442695, %v393_v49 }
 0x147   :  { %3756 = vpow2.f32 %v3083_v51 }
 0x14f   :  { %v3755_v50 = vpop.eup %3754 }
 0x150   :  { %403 = vrot.lane.b32.xlu0 %v3755_v50, %s4028_s21 }
 0x151   :  { %v3757_v52 = vpop.eup %3756 }
 0x152   :  { %v397_v53 = vadd.f32 1.0, %v3757_v52 }
 0x154   :  { %3758 = vrcp.f32 %v397_v53 }
 0x15e   :  { %v3759_v54 = vpop.eup %3758 }
 0x15f   :  { %v401_v57 = vmul.f32 0.0, %v3759_v54 }
 0x1c2   :  { %v404_v55 = vpop.permute.xlu0 %403 }
 0x1c3   :  { %v406_v56 = vmul.f32 %v3759_v54, %v404_v55 }
 0x1c5   :  { %408 = vrot.lane.b32.xlu0 %v406_v56, %s4020_s4 }
 0x237   :  { %v409_v58 = vpop.permute.xlu0 %408 }
 0x238   :  { %v4229_v59 = vadd.f32 %v409_v58, %v401_v57 }
 0x23a   :  { %3760 = vtanh.f32 %v4229_v59 }
 0x244   :  { %v3761_v4 = vpop.eup %3760 }
 0x245   :  { %414 = vrot.lane.b32.xlu1 %v3761_v4, %s4028_s21 }
 0x2b7   :  { %v415_v5 = vpop.permute.xlu1 %414 }
 0x2b8   :  { %v417_v7 = vmul.f32 %v3759_v54, %v415_v5 }
 0x2ba   :  { %v431_v9 = vrot.slane %v417_v7, %v4189_v16 }
 0x2bc   :  { %432 = vrot.lane.b32.xlu1 %v431_v9, %s4020_s4 }
 0x32e   :  { %v433_v15 = vpop.permute.xlu1 %432 }
 0x32f   :  { %3296 = vmatmul.mubr.msk.f32.vlgmr.msra.gmra.mrb[2].mxu1 %vm319_vm3, %v433_v15  ;;  %3318 = vmatmul.mubr.msk.f32.vlgmr.msra.gmra.mrb[2].mxu0 %vm319_vm3, %v433_v15 }
 0x330   :  { %3573 = vmatpush3.bf16.msra.mxu1 %v4243_v12  ;;  %3306 = vmatprep.mubr.msk.f32.mxu1 %vm4026_vm0, %v4027_v6 }
 0x331   :  { %3574 = vmatprep.subr.bf16.mxu1 %v4024_v3  ;;  %3585 = vmatpush3.bf16.msra.mxu0 %v4232_v63 }
 0x332   :  { %3586 = vmatprep.subr.bf16.mxu0 %v4024_v3  ;;  %3328 = vmatprep.mubr.msk.f32.mxu0 %vm4026_vm0, %v4027_v6 }
 0x334   :  { %3576 = vmatpush3.bf16.msra.mxu1 %v4248_v17 }
 0x335   :  { %3595 = vmatprep.subr.bf16.mxu1 %v4024_v3  ;;  %3588 = vmatpush3.bf16.msra.mxu0 %v4235_v1 }
 0x336   :  { %3589 = vmatprep.subr.bf16.mxu0 %v4024_v3 }
 0x337   :  { %3307 = vmatmul.mubr.f32.vlgmr.msra.gmra.mrb[2].mxu1 %v4027_v6 }
 0x338   :  { %3597 = vmatpush3.bf16.msra.mxu1 %v4191_v18  ;;  %3350 = vmatprep.mubr.msk.f32.mxu1 %vm4026_vm0, %v4027_v6 }
 0x339   :  { %3598 = vmatprep.subr.bf16.mxu1 %v4024_v3 }
 0x33c   :  { %3600 = vmatpush3.bf16.msra.mxu1 %v4197_v36 }
 0x33d   :  { %3601 = vmatprep.subr.bf16.mxu1 %v4024_v3 }
 0x402   :  { %v667_v20 = vpop.f32.mrb[2].mxu0 }
 0x403   :  { %v671_v21 = vadd.f32 %v667_v20, %v279_v19  ;;  %v3319_v22 = vpop.f32.mrb[3].mxu0 }
 0x405   :  { %3762 = vtanh.f32 %v671_v21  ;;  %v3088_v29 = vmul.f32 -1.442695, %v671_v21 }
 0x40a   :  { %v572_v24 = vpop.f32.mrb[2].mxu1 }
 0x40b   :  { %v3711_v25 = vadd.f32 %v4273_v23, %v572_v24  ;;  %v3308_v26 = vpop.f32.mrb[3].mxu1 }
 0x40d   :  { %3764 = vtanh.f32 %v3711_v25  ;;  %v3086_v30 = vmul.f32 -1.442695, %v3711_v25 }
 0x40e   :  { %3766 = vpow2.f32 %v3088_v29 }
 0x40f   :  { %v3763_v27 = vpop.eup %3762  ;;  %3768 = vpow2.f32 %v3086_v30 }
 0x410   :  { %681 = vrot.lane.b32.xlu0 %v3763_v27, %s4028_s21 }
 0x417   :  { %v3765_v28 = vpop.eup %3764 }
 0x418   :  { %586 = vrot.lane.b32.xlu1 %v3765_v28, %s4028_s21  ;;  %v3767_v31 = vpop.eup %3766 }
 0x419   :  { %v675_v32 = vadd.f32 1.0, %v3767_v31  ;;  %v3769_v33 = vpop.eup %3768 }
 0x41a   :  { %v580_v34 = vadd.f32 1.0, %v3769_v33 }
 0x41b   :  { %3770 = vrcp.f32 %v675_v32 }
 0x41c   :  { %3772 = vrcp.f32 %v580_v34 }
 0x425   :  { %v3771_v35 = vpop.eup %3770 }
 0x426   :  { %v3773_v39 = vpop.eup %3772  ;;  %v679_v42 = vmul.f32 %v3771_v35, %v4229_v59  ;;  %v264_v59 = vcombine.high %v4220_v47, %v4220_v47 }
 0x427   :  { %v584_v46 = vmul.f32 0.0, %v3773_v39 }
 0x428   :  { %v4319_v60 = vrot.slane %v264_v59, %v4189_v16 }
 0x482   :  { %v682_v37 = vpop.permute.xlu0 %681 }
 0x483   :  { %v684_v38 = vmul.f32 %v3771_v35, %v682_v37 }
 0x485   :  { %686 = vrot.lane.b32.xlu0 %v684_v38, %s4020_s4 }
 0x48a   :  { %v587_v40 = vpop.permute.xlu1 %586 }
 0x48b   :  { %v589_v41 = vmul.f32 %v3773_v39, %v587_v40 }
 0x48d   :  { %591 = vrot.lane.b32.xlu1 %v589_v41, %s4020_s4 }
 0x4f7   :  { %v687_v43 = vpop.permute.xlu0 %686 }
 0x4f8   :  { %v4281_v44 = vadd.f32 %v687_v43, %v679_v42 }
 0x4fa   :  { %3774 = vtanh.f32 %v4281_v44 }
 0x4ff   :  { %v592_v48 = vpop.permute.xlu1 %591 }
 0x500   :  { %v4284_v49 = vadd.f32 %v592_v48, %v584_v46  ;;  %v4345_v48 = vsub.s32 0, %v4186_v8 }
 0x502   :  { %3776 = vtanh.f32 %v4284_v49 }
 0x504   :  { %v3775_v50 = vpop.eup %3774 }
 0x505   :  { %692 = vrot.lane.b32.xlu0 %v3775_v50, %s4028_s21 }
 0x50c   :  { %v3777_v51 = vpop.eup %3776 }
 0x50d   :  { %597 = vrot.lane.b32.xlu1 %v3777_v51, %s4028_s21 }
 0x577   :  { %v693_v52 = vpop.permute.xlu0 %692 }
 0x578   :  { %v695_v53 = vmul.f32 %v3771_v35, %v693_v52  ;;  %v4029_v35 = vmov 1966171168  }
 0x579   :  { %v2541_v37 = vunpack.c.l.s4 %v4029_v35 }
 0x57a   :  { %v703_v54 = vrot.slane %v695_v53, %v4189_v16 }
 0x57c   :  { %704 = vrot.lane.b32.xlu0 %v703_v54, %s4020_s4 }
 0x57f   :  { %v598_v55 = vpop.permute.xlu1 %597 }
 0x580   :  { %v4291_v56 = vmul.f32 %v3773_v39, %v598_v55  ;;  %v2542_v39 = vunpack.c.0.s8 %v2541_v37 }
 0x582   :  { %779 = vrot.lane.b32.xlu1 %v4291_v56, %s4020_s4  ;;  %v4339_v42 = vsub.s32 %v2542_v39, %v4186_v8 }
 0x5ee   :  { %v705_v57 = vpop.permute.xlu0 %704 }
 0x5ef   :  { %3329 = vmatmul.mubr.msk.f32.vlgmr.msra.gmra.mrb[4].mxu0 %vm319_vm3, %v705_v57  ;;  %3351 = vmatmul.mubr.msk.f32.vlgmr.msra.gmra.mrb[4].mxu1 %vm319_vm3, %v705_v57 }
 0x5f0   :  { %3591 = vmatpush3.bf16.msra.mxu0 %v4243_v12  ;;  %3339 = vmatprep.mubr.msk.f32.mxu0 %vm4026_vm0, %v4027_v6 }
 0x5f1   :  { %3592 = vmatprep.subr.bf16.mxu0 %v4024_v3  ;;  %3603 = vmatpush3.bf16.msra.mxu1 %v4232_v63 }
 0x5f2   :  { %3604 = vmatprep.subr.bf16.mxu1 %v4024_v3  ;;  %3361 = vmatprep.mubr.msk.f32.mxu1 %vm4026_vm0, %v4027_v6 }
 0x5f4   :  { %3594 = vmatpush3.bf16.msra.mxu0 %v4248_v17  ;;  %v780_v58 = vpop.permute.xlu1 %779 }
 0x5f5   :  { %3613 = vmatprep.subr.bf16.mxu0 %v4024_v3  ;;  %3606 = vmatpush3.bf16.msra.mxu1 %v4235_v1 }
 0x5f6   :  { %3607 = vmatprep.subr.bf16.mxu1 %v4024_v3 }
 0x5f7   :  { %3340 = vmatmul.mubr.msk.f32.vlgmr.msra.gmra.mrb[4].mxu0 %vm319_vm3, %v780_v58 }
 0x5f8   :  { %3615 = vmatpush3.bf16.msra.mxu0 %v4191_v18  ;;  %3383 = vmatprep.mubr.msk.f32.mxu0 %vm4026_vm0, %v4027_v6 }
 0x5f9   :  { %3616 = vmatprep.subr.bf16.mxu0 %v4024_v3 }
 0x5fc   :  { %3618 = vmatpush3.bf16.msra.mxu0 %v4197_v36 }
 0x5fd   :  { %3619 = vmatprep.subr.bf16.mxu0 %v4024_v3 }
 0x6c2   :  { %v944_v61 = vpop.f32.mrb[4].mxu1 }
 0x6c3   :  { %v948_v62 = vadd.f32 %v944_v61, %v4319_v60  ;;  %v3352_v0 = vpop.f32.mrb[5].mxu1 }
 0x6c4   :  { %v280_v0 = vcombine.high %v4319_v60, %v4319_v60 }
 0x6c5   :  { %3778 = vtanh.f32 %v948_v62  ;;  %v3093_v47 = vmul.f32 -1.442695, %v948_v62 }
 0x6ca   :  { %v849_v4 = vpop.f32.mrb[4].mxu0 }
 0x6cb   :  { %v3712_v5 = vadd.f32 %v4273_v23, %v849_v4  ;;  %v3341_v7 = vpop.f32.mrb[5].mxu0 }
 0x6cd   :  { %3780 = vtanh.f32 %v3712_v5  ;;  %v3091_v11 = vmul.f32 -1.442695, %v3712_v5 }
 0x6ce   :  { %3782 = vpow2.f32 %v3093_v47 }
 0x6cf   :  { %v3779_v9 = vpop.eup %3778  ;;  %3784 = vpow2.f32 %v3091_v11 }
 0x6d0   :  { %958 = vrot.lane.b32.xlu0 %v3779_v9, %s4028_s21 }
 0x6d7   :  { %v3781_v10 = vpop.eup %3780 }
 0x6d8   :  { %863 = vrot.lane.b32.xlu1 %v3781_v10, %s4028_s21  ;;  %v3783_v13 = vpop.eup %3782 }
 0x6d9   :  { %v952_v14 = vadd.f32 1.0, %v3783_v13  ;;  %v3785_v15 = vpop.eup %3784 }
 0x6da   :  { %v857_v19 = vadd.f32 1.0, %v3785_v15 }
 0x6db   :  { %3786 = vrcp.f32 %v952_v14 }
 0x6dc   :  { %3788 = vrcp.f32 %v857_v19 }
 0x6e5   :  { %v3787_v20 = vpop.eup %3786 }
 0x6e6   :  { %v3789_v24 = vpop.eup %3788  ;;  %v956_v27 = vmul.f32 %v3787_v20, %v4281_v44  ;;  %v2546_v44 = vrot.slane %v4291_v56, %v4339_v42 }
 0x6e7   :  { %v861_v30 = vmul.f32 %v3789_v24, %v4284_v49 }
 0x6e8   :  { %v2547_v50 = vcombine.high %v2546_v44, %v2546_v44  ;;  %v2554_v53 = vrot.slane %v2546_v44, %v4339_v42 }
 0x6ea   :  { %v2561_v56 = vrot.slane %v2547_v50, %v4339_v42 }
 0x742   :  { %v959_v21 = vpop.permute.xlu0 %958 }
 0x743   :  { %v961_v22 = vmul.f32 %v3787_v20, %v959_v21 }
 0x745   :  { %963 = vrot.lane.b32.xlu0 %v961_v22, %s4020_s4 }
 0x74a   :  { %v864_v25 = vpop.permute.xlu1 %863 }
 0x74b   :  { %v866_v26 = vmul.f32 %v3789_v24, %v864_v25 }
 0x74d   :  { %868 = vrot.lane.b32.xlu1 %v866_v26, %s4020_s4 }
 0x7b7   :  { %v964_v28 = vpop.permute.xlu0 %963 }
 0x7b8   :  { %v4328_v29 = vadd.f32 %v964_v28, %v956_v27 }
 0x7ba   :  { %3790 = vtanh.f32 %v4328_v29 }
 0x7bf   :  { %v869_v31 = vpop.permute.xlu1 %868 }
 0x7c0   :  { %v4332_v32 = vadd.f32 %v869_v31, %v861_v30 }
 0x7c2   :  { %3792 = vtanh.f32 %v4332_v32 }
 0x7c4   :  { %v3791_v33 = vpop.eup %3790 }
 0x7c5   :  { %969 = vrot.lane.b32.xlu0 %v3791_v33, %s4028_s21 }
 0x7cc   :  { %v3793_v34 = vpop.eup %3792 }
 0x7cd   :  { %874 = vrot.lane.b32.xlu1 %v3793_v34, %s4028_s21 }
 0x837   :  { %v970_v38 = vpop.permute.xlu0 %969 }
 0x838   :  { %v972_v40 = vmul.f32 %v3787_v20, %v970_v38 }
 0x83a   :  { %v980_v41 = vrot.slane %v972_v40, %v4189_v16 }
 0x83c   :  { %981 = vrot.lane.b32.xlu0 %v980_v41, %s4020_s4 }
 0x83f   :  { %v875_v43 = vpop.permute.xlu1 %874 }
 0x840   :  { %v877_v46 = vmul.f32 %v3789_v24, %v875_v43 }
 0x842   :  { %v2570_v49 = vrot.slane %v877_v46, %v4339_v42  ;;  %1056 = vrot.lane.b32.xlu1 %v877_v46, %s4020_s4 }
 0x844   :  { %v2571_v51 = vcombine.high %v2570_v49, %v2570_v49  ;;  %v2578_v52 = vrot.slane %v2570_v49, %v4339_v42 }
 0x846   :  { %v2585_v54 = vrot.slane %v2571_v51, %v4339_v42  ;;  %v2722_v55 = vrot.slane %v2578_v52, %v4345_v48 }
 0x848   :  { %v2726_v57 = vrot.slane %v2585_v54, %v4345_v48  ;;  %v4355_v58 = vsel %vm2789_vm4, %v2554_v53, %v2722_v55 }
 0x84a   :  { %v4357_v59 = vsel %vm2789_vm4, %v2561_v56, %v2726_v57  ;;  %v4434_v57 = vrot.slane %v4218_v45, %v4189_v16 }
 0x8ae   :  { %v982_v61 = vpop.permute.xlu0 %981 }
 0x8af   :  { %3362 = vmatmul.mubr.msk.f32.vlgmr.msra.gmra.mrb[6].mxu1 %vm319_vm3, %v982_v61  ;;  %3384 = vmatmul.mubr.msk.f32.vlgmr.msra.gmra.mrb[6].mxu0 %vm319_vm3, %v982_v61 }
 0x8b0   :  { %3609 = vmatpush3.bf16.msra.mxu1 %v4243_v12  ;;  %3372 = vmatprep.mubr.msk.f32.mxu1 %vm4026_vm0, %v4027_v6 }
 0x8b1   :  { %3610 = vmatprep.subr.bf16.mxu1 %v4024_v3  ;;  %3621 = vmatpush3.bf16.msra.mxu0 %v4232_v63 }
 0x8b2   :  { %3622 = vmatprep.subr.bf16.mxu0 %v4024_v3  ;;  %3394 = vmatprep.mubr.msk.f32.mxu0 %vm4026_vm0, %v4027_v6 }
 0x8b4   :  { %3612 = vmatpush3.bf16.msra.mxu1 %v4248_v17  ;;  %v1057_v62 = vpop.permute.xlu1 %1056 }
 0x8b5   :  { %3631 = vmatprep.subr.bf16.mxu1 %v4024_v3  ;;  %3624 = vmatpush3.bf16.msra.mxu0 %v4235_v1 }
 0x8b6   :  { %3625 = vmatprep.subr.bf16.mxu0 %v4024_v3 }
 0x8b7   :  { %3373 = vmatmul.mubr.msk.f32.vlgmr.msra.gmra.mrb[6].mxu1 %vm319_vm3, %v1057_v62 }
 0x8b8   :  { %3633 = vmatpush3.bf16.msra.mxu1 %v4191_v18  ;;  %3416 = vmatprep.mubr.msk.f32.mxu1 %vm4026_vm0, %v4027_v6 }
 0x8b9   :  { %3634 = vmatprep.subr.bf16.mxu1 %v4024_v3 }
 0x8bc   :  { %3636 = vmatpush3.bf16.msra.mxu1 %v4197_v36 }
 0x8bd   :  { %3637 = vmatprep.subr.bf16.mxu1 %v4024_v3 }
 0x982   :  { %v1221_v4 = vpop.f32.mrb[6].mxu0 }
 0x983   :  { %v1225_v5 = vadd.f32 %v1221_v4, %v280_v0  ;;  %v3385_v7 = vpop.f32.mrb[7].mxu0 }
 0x985   :  { %3794 = vtanh.f32 %v1225_v5  ;;  %v3098_v14 = vmul.f32 -1.442695, %v1225_v5 }
 0x98a   :  { %v1126_v9 = vpop.f32.mrb[6].mxu1 }
 0x98b   :  { %v3713_v10 = vadd.f32 %v4273_v23, %v1126_v9  ;;  %v3374_v47 = vpop.f32.mrb[7].mxu1 }
 0x98d   :  { %3796 = vtanh.f32 %v3713_v10  ;;  %v3096_v15 = vmul.f32 -1.442695, %v3713_v10 }
 0x98e   :  { %3798 = vpow2.f32 %v3098_v14 }
 0x98f   :  { %v3795_v11 = vpop.eup %3794  ;;  %3800 = vpow2.f32 %v3096_v15 }
 0x990   :  { %1235 = vrot.lane.b32.xlu0 %v3795_v11, %s4028_s21 }
 0x997   :  { %v3797_v13 = vpop.eup %3796 }
 0x998   :  { %1140 = vrot.lane.b32.xlu1 %v3797_v13, %s4028_s21  ;;  %v3799_v60 = vpop.eup %3798 }
 0x999   :  { %v1229_v19 = vadd.f32 1.0, %v3799_v60  ;;  %v3801_v20 = vpop.eup %3800 }
 0x99a   :  { %v1134_v21 = vadd.f32 1.0, %v3801_v20 }
 0x99b   :  { %3802 = vrcp.f32 %v1229_v19 }
 0x99c   :  { %3804 = vrcp.f32 %v1134_v21 }
 0x9a5   :  { %v3803_v22 = vpop.eup %3802 }
 0x9a6   :  { %v3805_v26 = vpop.eup %3804  ;;  %v1233_v30 = vmul.f32 %v3803_v22, %v4328_v29 }
 0x9a7   :  { %v1138_v34 = vmul.f32 %v3805_v26, %v4332_v32 }
 0xa02   :  { %v1236_v24 = vpop.permute.xlu0 %1235 }
 0xa03   :  { %v1238_v25 = vmul.f32 %v3803_v22, %v1236_v24 }
 0xa05   :  { %1240 = vrot.lane.b32.xlu0 %v1238_v25, %s4020_s4 }
 0xa0a   :  { %v1141_v27 = vpop.permute.xlu1 %1140 }
 0xa0b   :  { %v1143_v28 = vmul.f32 %v3805_v26, %v1141_v27 }
 0xa0d   :  { %1145 = vrot.lane.b32.xlu1 %v1143_v28, %s4020_s4 }
 0xa77   :  { %v1241_v31 = vpop.permute.xlu0 %1240 }
 0xa78   :  { %v4388_v33 = vadd.f32 %v1241_v31, %v1233_v30 }
 0xa7a   :  { %3806 = vtanh.f32 %v4388_v33 }
 0xa7f   :  { %v1146_v35 = vpop.permute.xlu1 %1145 }
 0xa80   :  { %v4392_v37 = vadd.f32 %v1146_v35, %v1138_v34 }
 0xa82   :  { %3808 = vtanh.f32 %v4392_v37 }
 0xa84   :  { %v3807_v38 = vpop.eup %3806 }
 0xa85   :  { %1246 = vrot.lane.b32.xlu0 %v3807_v38, %s4028_s21 }
 0xa8c   :  { %v3809_v39 = vpop.eup %3808 }
 0xa8d   :  { %1151 = vrot.lane.b32.xlu1 %v3809_v39, %s4028_s21 }
 0xaf7   :  { %v1247_v40 = vpop.permute.xlu0 %1246 }
 0xaf8   :  { %v1249_v29 = vmul.f32 %v3803_v22, %v1247_v40 }
 0xafa   :  { %v1257_v41 = vrot.slane %v1249_v29, %v4189_v16 }
 0xafc   :  { %1258 = vrot.lane.b32.xlu0 %v1257_v41, %s4020_s4 }
 0xaff   :  { %v1152_v43 = vpop.permute.xlu1 %1151 }
 0xb00   :  { %v1154_v44 = vmul.f32 %v3805_v26, %v1152_v43 }
 0xb02   :  { %v2592_v32 = vrot.slane %v1154_v44, %v4339_v42  ;;  %1333 = vrot.lane.b32.xlu1 %v1154_v44, %s4020_s4 }
 0xb04   :  { %v2593_v46 = vcombine.high %v2592_v32, %v2592_v32  ;;  %v2600_v49 = vrot.slane %v2592_v32, %v4339_v42 }
 0xb06   :  { %v2607_v50 = vrot.slane %v2593_v46, %v4339_v42  ;;  %v2732_v51 = vrot.slane %v2600_v49, %v4345_v48 }
 0xb08   :  { %v2736_v52 = vrot.slane %v2607_v50, %v4345_v48  ;;  %v4406_v53 = vsel %vm2792_vm5, %v4355_v58, %v2732_v51 }
 0xb0a   :  { %v4409_v54 = vsel %vm2792_vm5, %v4357_v59, %v2736_v52  ;;  %v296_v52 = vcombine.high %v4434_v57, %v4434_v57 }
 0xb6e   :  { %v1259_v55 = vpop.permute.xlu0 %1258 }
 0xb6f   :  { %3395 = vmatmul.mubr.msk.f32.vlgmr.msra.gmra.mrb[8].mxu0 %vm319_vm3, %v1259_v55  ;;  %3417 = vmatmul.mubr.msk.f32.vlgmr.msra.gmra.mrb[8].mxu1 %vm319_vm3, %v1259_v55 }
 0xb70   :  { %3627 = vmatpush3.bf16.msra.mxu0 %v4243_v12  ;;  %3405 = vmatprep.mubr.msk.f32.mxu0 %vm4026_vm0, %v4027_v6 }
 0xb71   :  { %3628 = vmatprep.subr.bf16.mxu0 %v4024_v3  ;;  %3639 = vmatpush3.bf16.msra.mxu1 %v4232_v63 }
 0xb72   :  { %3640 = vmatprep.subr.bf16.mxu1 %v4024_v3  ;;  %3427 = vmatprep.mubr.msk.f32.mxu1 %vm4026_vm0, %v4027_v6 }
 0xb74   :  { %3630 = vmatpush3.bf16.msra.mxu0 %v4248_v17  ;;  %v1334_v56 = vpop.permute.xlu1 %1333 }
 0xb75   :  { %3649 = vmatprep.subr.bf16.mxu0 %v4024_v3  ;;  %3642 = vmatpush3.bf16.msra.mxu1 %v4235_v1 }
 0xb76   :  { %3643 = vmatprep.subr.bf16.mxu1 %v4024_v3 }
 0xb77   :  { %3406 = vmatmul.mubr.msk.f32.vlgmr.msra.gmra.mrb[8].mxu0 %vm319_vm3, %v1334_v56 }
 0xb78   :  { %3651 = vmatpush3.bf16.msra.mxu0 %v4191_v18  ;;  %3449 = vmatprep.mubr.msk.f32.mxu0 %vm4026_vm0, %v4027_v6 }
 0xb79   :  { %3652 = vmatprep.subr.bf16.mxu0 %v4024_v3 }
 0xb7c   :  { %3654 = vmatpush3.bf16.msra.mxu0 %v4197_v36 }
 0xb7d   :  { %3655 = vmatprep.subr.bf16.mxu0 %v4024_v3 }
 0xc42   :  { %v1498_v58 = vpop.f32.mrb[8].mxu1 }
 0xc43   :  { %v1502_v59 = vadd.f32 %v1498_v58, %v4434_v57  ;;  %v3418_v61 = vpop.f32.mrb[9].mxu1 }
 0xc45   :  { %3810 = vtanh.f32 %v1502_v59  ;;  %v3103_v9 = vmul.f32 -1.442695, %v1502_v59 }
 0xc4a   :  { %v1403_v62 = vpop.f32.mrb[8].mxu0 }
 0xc4b   :  { %v3714_v0 = vadd.f32 %v4273_v23, %v1403_v62  ;;  %v3407_v4 = vpop.f32.mrb[9].mxu0 }
 0xc4d   :  { %3812 = vtanh.f32 %v3714_v0  ;;  %v3101_v10 = vmul.f32 -1.442695, %v3714_v0 }
 0xc4e   :  { %3814 = vpow2.f32 %v3103_v9 }
 0xc4f   :  { %v3811_v5 = vpop.eup %3810  ;;  %3816 = vpow2.f32 %v3101_v10 }
 0xc50   :  { %1512 = vrot.lane.b32.xlu0 %v3811_v5, %s4028_s21 }
 0xc57   :  { %v3813_v7 = vpop.eup %3812 }
 0xc58   :  { %1417 = vrot.lane.b32.xlu1 %v3813_v7, %s4028_s21  ;;  %v3815_v47 = vpop.eup %3814 }
 0xc59   :  { %v1506_v11 = vadd.f32 1.0, %v3815_v47  ;;  %v3817_v13 = vpop.eup %3816 }
 0xc5a   :  { %v1411_v14 = vadd.f32 1.0, %v3817_v13 }
 0xc5b   :  { %3818 = vrcp.f32 %v1506_v11 }
 0xc5c   :  { %3820 = vrcp.f32 %v1411_v14 }
 0xc65   :  { %v3819_v15 = vpop.eup %3818 }
 0xc66   :  { %v3821_v20 = vpop.eup %3820  ;;  %v1510_v24 = vmul.f32 %v3819_v15, %v4388_v33 }
 0xc67   :  { %v1415_v27 = vmul.f32 %v3821_v20, %v4392_v37 }
 0xcc2   :  { %v1513_v60 = vpop.permute.xlu0 %1512 }
 0xcc3   :  { %v1515_v19 = vmul.f32 %v3819_v15, %v1513_v60 }
 0xcc5   :  { %1517 = vrot.lane.b32.xlu0 %v1515_v19, %s4020_s4 }
 0xcca   :  { %v1418_v21 = vpop.permute.xlu1 %1417 }
 0xccb   :  { %v1420_v22 = vmul.f32 %v3821_v20, %v1418_v21 }
 0xccd   :  { %1422 = vrot.lane.b32.xlu1 %v1420_v22, %s4020_s4 }
 0xd37   :  { %v1518_v25 = vpop.permute.xlu0 %1517 }
 0xd38   :  { %v4443_v26 = vadd.f32 %v1518_v25, %v1510_v24 }
 0xd3a   :  { %3822 = vtanh.f32 %v4443_v26 }
 0xd3f   :  { %v1423_v28 = vpop.permute.xlu1 %1422 }
 0xd40   :  { %v4447_v30 = vadd.f32 %v1423_v28, %v1415_v27 }
 0xd42   :  { %3824 = vtanh.f32 %v4447_v30 }
 0xd44   :  { %v3823_v31 = vpop.eup %3822 }
 0xd45   :  { %1523 = vrot.lane.b32.xlu0 %v3823_v31, %s4028_s21 }
 0xd4c   :  { %v3825_v34 = vpop.eup %3824 }
 0xd4d   :  { %1428 = vrot.lane.b32.xlu1 %v3825_v34, %s4028_s21 }
 0xdb7   :  { %v1524_v35 = vpop.permute.xlu0 %1523 }
 0xdb8   :  { %v1526_v33 = vmul.f32 %v3819_v15, %v1524_v35 }
 0xdba   :  { %v1534_v38 = vrot.slane %v1526_v33, %v4189_v16 }
 0xdbc   :  { %1535 = vrot.lane.b32.xlu0 %v1534_v38, %s4020_s4 }
 0xdbf   :  { %v1429_v39 = vpop.permute.xlu1 %1428 }
 0xdc0   :  { %v1431_v40 = vmul.f32 %v3821_v20, %v1429_v39 }
 0xdc2   :  { %v2614_v37 = vrot.slane %v1431_v40, %v4339_v42  ;;  %1610 = vrot.lane.b32.xlu1 %v1431_v40, %s4020_s4 }
 0xdc4   :  { %v2615_v29 = vcombine.high %v2614_v37, %v2614_v37  ;;  %v2622_v41 = vrot.slane %v2614_v37, %v4339_v42 }
 0xdc6   :  { %v2629_v43 = vrot.slane %v2615_v29, %v4339_v42  ;;  %v2742_v44 = vrot.slane %v2622_v41, %v4345_v48 }
 0xdc8   :  { %v2746_v32 = vrot.slane %v2629_v43, %v4345_v48  ;;  %v4461_v46 = vsel %vm2795_vm6, %v4406_v53, %v2742_v44 }
 0xdca   :  { %v4464_v49 = vsel %vm2795_vm6, %v4409_v54, %v2746_v32  ;;  %v281_v32 = vcombine.high %v4218_v45, %v4218_v45 }
 0xe2e   :  { %v1536_v50 = vpop.permute.xlu0 %1535 }
 0xe2f   :  { %3428 = vmatmul.mubr.msk.f32.vlgmr.msra.gmra.mrb[10].mxu1 %vm319_vm3, %v1536_v50  ;;  %3450 = vmatmul.mubr.msk.f32.vlgmr.msra.gmra.mrb[10].mxu0 %vm319_vm3, %v1536_v50 }
 0xe30   :  { %3645 = vmatpush3.bf16.msra.mxu1 %v4243_v12  ;;  %3438 = vmatprep.mubr.msk.f32.mxu1 %vm4026_vm0, %v4027_v6 }
 0xe31   :  { %3646 = vmatprep.subr.bf16.mxu1 %v4024_v3  ;;  %3657 = vmatpush3.bf16.msra.mxu0 %v4232_v63 }
 0xe32   :  { %3658 = vmatprep.subr.bf16.mxu0 %v4024_v3  ;;  %3460 = vmatprep.mubr.msk.f32.mxu0 %vm4026_vm0, %v4027_v6 }
 0xe34   :  { %3648 = vmatpush3.bf16.msra.mxu1 %v4248_v17  ;;  %v1611_v51 = vpop.permute.xlu1 %1610 }
 0xe35   :  { %3667 = vmatprep.subr.bf16.mxu1 %v4024_v3  ;;  %3660 = vmatpush3.bf16.msra.mxu0 %v4235_v1 }
 0xe36   :  { %3661 = vmatprep.subr.bf16.mxu0 %v4024_v3 }
 0xe37   :  { %3439 = vmatmul.mubr.msk.f32.vlgmr.msra.gmra.mrb[10].mxu1 %vm319_vm3, %v1611_v51 }
 0xe38   :  { %3669 = vmatpush3.bf16.msra.mxu1 %v4191_v18  ;;  %3482 = vmatprep.mubr.msk.f32.mxu1 %vm4026_vm0, %v4027_v6 }
 0xe39   :  { %3670 = vmatprep.subr.bf16.mxu1 %v4024_v3 }
 0xe3c   :  { %3672 = vmatpush3.bf16.msra.mxu1 %v4197_v36 }
 0xe3d   :  { %3673 = vmatprep.subr.bf16.mxu1 %v4024_v3 }
 0xf02   :  { %v1775_v53 = vpop.f32.mrb[10].mxu0 }
 0xf03   :  { %v1779_v54 = vadd.f32 %v1775_v53, %v296_v52  ;;  %v3451_v55 = vpop.f32.mrb[11].mxu0 }
 0xf05   :  { %3826 = vtanh.f32 %v1779_v54  ;;  %v3108_v0 = vmul.f32 -1.442695, %v1779_v54 }
 0xf0a   :  { %v1680_v56 = vpop.f32.mrb[10].mxu1 }
 0xf0b   :  { %v3715_v58 = vadd.f32 %v4273_v23, %v1680_v56  ;;  %v3440_v59 = vpop.f32.mrb[11].mxu1 }
 0xf0d   :  { %3828 = vtanh.f32 %v3715_v58  ;;  %v3106_v4 = vmul.f32 -1.442695, %v3715_v58 }
 0xf0e   :  { %3830 = vpow2.f32 %v3108_v0 }
 0xf0f   :  { %v3827_v61 = vpop.eup %3826  ;;  %3832 = vpow2.f32 %v3106_v4 }
 0xf10   :  { %1789 = vrot.lane.b32.xlu0 %v3827_v61, %s4028_s21 }
 0xf17   :  { %v3829_v62 = vpop.eup %3828 }
 0xf18   :  { %1694 = vrot.lane.b32.xlu1 %v3829_v62, %s4028_s21  ;;  %v3831_v57 = vpop.eup %3830 }
 0xf19   :  { %v1783_v5 = vadd.f32 1.0, %v3831_v57  ;;  %v3833_v7 = vpop.eup %3832 }
 0xf1a   :  { %v1688_v9 = vadd.f32 1.0, %v3833_v7 }
 0xf1b   :  { %3834 = vrcp.f32 %v1783_v5 }
 0xf1c   :  { %3836 = vrcp.f32 %v1688_v9 }
 0xf25   :  { %v3835_v10 = vpop.eup %3834 }
 0xf26   :  { %v3837_v13 = vpop.eup %3836  ;;  %v1787_v60 = vmul.f32 %v3835_v10, %v4443_v26 }
 0xf27   :  { %v1692_v21 = vmul.f32 %v3837_v13, %v4447_v30 }
 0xf82   :  { %v1790_v47 = vpop.permute.xlu0 %1789 }
 0xf83   :  { %v1792_v11 = vmul.f32 %v3835_v10, %v1790_v47 }
 0xf85   :  { %1794 = vrot.lane.b32.xlu0 %v1792_v11, %s4020_s4 }
 0xf8a   :  { %v1695_v14 = vpop.permute.xlu1 %1694 }
 0xf8b   :  { %v1697_v15 = vmul.f32 %v3837_v13, %v1695_v14 }
 0xf8d   :  { %1699 = vrot.lane.b32.xlu1 %v1697_v15, %s4020_s4 }
 0xff7   :  { %v1795_v19 = vpop.permute.xlu0 %1794 }
 0xff8   :  { %v4495_v20 = vadd.f32 %v1795_v19, %v1787_v60 }
 0xffa   :  { %3838 = vtanh.f32 %v4495_v20 }
 0xfff   :  { %v1700_v22 = vpop.permute.xlu1 %1699 }
0x1000   :  { %v4499_v24 = vadd.f32 %v1700_v22, %v1692_v21 }
0x1002   :  { %3840 = vtanh.f32 %v4499_v24 }
0x1004   :  { %v3839_v25 = vpop.eup %3838 }
0x1005   :  { %1800 = vrot.lane.b32.xlu0 %v3839_v25, %s4028_s21 }
0x100c   :  { %v3841_v27 = vpop.eup %3840 }
0x100d   :  { %1705 = vrot.lane.b32.xlu1 %v3841_v27, %s4028_s21 }
0x1077   :  { %v1801_v28 = vpop.permute.xlu0 %1800 }
0x1078   :  { %v1803_v26 = vmul.f32 %v3835_v10, %v1801_v28 }
0x107a   :  { %v1811_v31 = vrot.slane %v1803_v26, %v4189_v16 }
0x107c   :  { %1812 = vrot.lane.b32.xlu0 %v1811_v31, %s4020_s4 }
0x107f   :  { %v1706_v34 = vpop.permute.xlu1 %1705 }
0x1080   :  { %v1708_v35 = vmul.f32 %v3837_v13, %v1706_v34 }
0x1082   :  { %v2636_v30 = vrot.slane %v1708_v35, %v4339_v42  ;;  %1887 = vrot.lane.b32.xlu1 %v1708_v35, %s4020_s4 }
0x1084   :  { %v2637_v33 = vcombine.high %v2636_v30, %v2636_v30  ;;  %v2644_v38 = vrot.slane %v2636_v30, %v4339_v42 }
0x1086   :  { %v2651_v39 = vrot.slane %v2637_v33, %v4339_v42  ;;  %v2752_v40 = vrot.slane %v2644_v38, %v4345_v48 }
0x1088   :  { %v2756_v37 = vrot.slane %v2651_v39, %v4345_v48  ;;  %v4514_v29 = vsel %vm183_vm1, %v4461_v46, %v2752_v40  ;;  %v4544_v46 = vrot.slane %v281_v32, %v4189_v16 }
0x108a   :  { %v4518_v41 = vsel %vm183_vm1, %v4464_v49, %v2756_v37  ;;  %v297_v39 = vcombine.high %v4544_v46, %v4544_v46 }
0x10ee   :  { %v1813_v43 = vpop.permute.xlu0 %1812 }
0x10ef   :  { %3461 = vmatmul.mubr.msk.f32.vlgmr.msra.gmra.mrb[12].mxu0 %vm319_vm3, %v1813_v43  ;;  %3483 = vmatmul.mubr.msk.f32.vlgmr.msra.gmra.mrb[12].mxu1 %vm319_vm3, %v1813_v43 }
0x10f0   :  { %3663 = vmatpush3.bf16.msra.mxu0 %v4243_v12  ;;  %3471 = vmatprep.mubr.msk.f32.mxu0 %vm4026_vm0, %v4027_v6 }
0x10f1   :  { %3664 = vmatprep.subr.bf16.mxu0 %v4024_v3  ;;  %3675 = vmatpush3.bf16.msra.mxu1 %v4232_v63 }
0x10f2   :  { %3676 = vmatprep.subr.bf16.mxu1 %v4024_v3  ;;  %3493 = vmatprep.mubr.msk.f32.mxu1 %vm4026_vm0, %v4027_v6 }
0x10f4   :  { %3666 = vmatpush3.bf16.msra.mxu0 %v4248_v17  ;;  %v1888_v44 = vpop.permute.xlu1 %1887 }
0x10f5   :  { %3685 = vmatprep.subr.bf16.mxu0 %v4024_v3  ;;  %3678 = vmatpush3.bf16.msra.mxu1 %v4235_v1 }
0x10f6   :  { %3679 = vmatprep.subr.bf16.mxu1 %v4024_v3 }
0x10f7   :  { %3472 = vmatmul.mubr.msk.f32.vlgmr.msra.gmra.mrb[12].mxu0 %vm319_vm3, %v1888_v44 }
0x10f8   :  { %3687 = vmatpush3.bf16.msra.mxu0 %v4191_v18  ;;  %3515 = vmatprep.mubr.msk.f32.mxu0 %vm4026_vm0, %v4027_v6 }
0x10f9   :  { %3688 = vmatprep.subr.bf16.mxu0 %v4024_v3 }
0x10fc   :  { %3690 = vmatpush3.bf16.msra.mxu0 %v4197_v36 }
0x10fd   :  { %3691 = vmatprep.subr.bf16.mxu0 %v4024_v3 }
0x11c2   :  { %v2052_v49 = vpop.f32.mrb[12].mxu1 }
0x11c3   :  { %v2056_v50 = vadd.f32 %v2052_v49, %v4544_v46  ;;  %v3484_v51 = vpop.f32.mrb[13].mxu1 }
0x11c5   :  { %3842 = vtanh.f32 %v2056_v50  ;;  %v3113_v45 = vmul.f32 -1.442695, %v2056_v50 }
0x11ca   :  { %v1957_v18 = vpop.f32.mrb[12].mxu0 }
0x11cb   :  { %v3716_v52 = vadd.f32 %v4273_v23, %v1957_v18  ;;  %v3473_v53 = vpop.f32.mrb[13].mxu0 }
0x11cd   :  { %3844 = vtanh.f32 %v3716_v52  ;;  %v3111_v55 = vmul.f32 -1.442695, %v3716_v52 }
0x11ce   :  { %3846 = vpow2.f32 %v3113_v45 }
0x11cf   :  { %v3843_v54 = vpop.eup %3842  ;;  %3848 = vpow2.f32 %v3111_v55 }
0x11d0   :  { %2066 = vrot.lane.b32.xlu0 %v3843_v54, %s4028_s21 }
0x11d7   :  { %v3845_v36 = vpop.eup %3844 }
0x11d8   :  { %1971 = vrot.lane.b32.xlu1 %v3845_v36, %s4028_s21  ;;  %v3847_v56 = vpop.eup %3846 }
0x11d9   :  { %v2060_v58 = vadd.f32 1.0, %v3847_v56  ;;  %v3849_v59 = vpop.eup %3848 }
0x11da   :  { %v1965_v61 = vadd.f32 1.0, %v3849_v59 }
0x11db   :  { %3850 = vrcp.f32 %v2060_v58 }
0x11dc   :  { %3852 = vrcp.f32 %v1965_v61 }
0x11e5   :  { %v3851_v62 = vpop.eup %3850 }
0x11e6   :  { %v3853_v57 = vpop.eup %3852  ;;  %v2064_v9 = vmul.f32 %v3851_v62, %v4495_v20 }
0x11e7   :  { %v1969_v11 = vmul.f32 %v3853_v57, %v4499_v24 }
0x1242   :  { %v2067_v0 = vpop.permute.xlu0 %2066 }
0x1243   :  { %v2069_v4 = vmul.f32 %v3851_v62, %v2067_v0 }
0x1245   :  { %2071 = vrot.lane.b32.xlu0 %v2069_v4, %s4020_s4 }
0x124a   :  { %v1972_v5 = vpop.permute.xlu1 %1971 }
0x124b   :  { %v1974_v7 = vmul.f32 %v3853_v57, %v1972_v5 }
0x124d   :  { %1976 = vrot.lane.b32.xlu1 %v1974_v7, %s4020_s4 }
0x12b7   :  { %v2072_v10 = vpop.permute.xlu0 %2071 }
0x12b8   :  { %v4553_v47 = vadd.f32 %v2072_v10, %v2064_v9 }
0x12ba   :  { %3854 = vtanh.f32 %v4553_v47 }
0x12bf   :  { %v1977_v13 = vpop.permute.xlu1 %1976 }
0x12c0   :  { %v4557_v14 = vadd.f32 %v1977_v13, %v1969_v11 }
0x12c2   :  { %3856 = vtanh.f32 %v4557_v14 }
0x12c4   :  { %v3855_v15 = vpop.eup %3854 }
0x12c5   :  { %2077 = vrot.lane.b32.xlu0 %v3855_v15, %s4028_s21 }
0x12cc   :  { %v3857_v60 = vpop.eup %3856 }
0x12cd   :  { %1982 = vrot.lane.b32.xlu1 %v3857_v60, %s4028_s21 }
0x1337   :  { %v2078_v19 = vpop.permute.xlu0 %2077 }
0x1338   :  { %v2080_v20 = vmul.f32 %v3851_v62, %v2078_v19 }
0x133a   :  { %v2088_v21 = vrot.slane %v2080_v20, %v4189_v16 }
0x133c   :  { %2089 = vrot.lane.b32.xlu0 %v2088_v21, %s4020_s4 }
0x133f   :  { %v1983_v22 = vpop.permute.xlu1 %1982 }
0x1340   :  { %v1985_v25 = vmul.f32 %v3853_v57, %v1983_v22 }
0x1342   :  { %v2658_v24 = vrot.slane %v1985_v25, %v4339_v42  ;;  %2164 = vrot.lane.b32.xlu1 %v1985_v25, %s4020_s4  ;;  %v3898_v25 = vld [vmem:[%s4681_s5] ss:$0 sm:$0xff] }
0x1344   :  { %v2659_v27 = vcombine.high %v2658_v24, %v2658_v24  ;;  %v2666_v28 = vrot.slane %v2658_v24, %v4339_v42 }
0x1346   :  { %v2673_v26 = vrot.slane %v2659_v27, %v4339_v42  ;;  %v2762_v31 = vrot.slane %v2666_v28, %v4345_v48 }
0x1348   :  { %v2766_v34 = vrot.slane %v2673_v26, %v4345_v48  ;;  %v4571_v35 = vsel %vm2800_vm7, %v4514_v29, %v2762_v31 }
0x134a   :  { %v4574_v30 = vsel %vm2800_vm7, %v4518_v41, %v2766_v34 }
0x13ae   :  { %v2090_v33 = vpop.permute.xlu0 %2089 }
0x13af   :  { %3494 = vmatmul.mubr.msk.f32.vlgmr.msra.gmra.mrb[14].mxu1 %vm319_vm3, %v2090_v33  ;;  %3516 = vmatmul.mubr.msk.f32.vlgmr.msra.gmra.mrb[14].mxu0 %vm319_vm3, %v2090_v33  ;;  %v2809_v33 = vld [vmem:[%s4683_s7] sm:$0xff] }
0x13b0   :  { %3681 = vmatpush3.bf16.msra.mxu1 %v4243_v12  ;;  %3504 = vmatprep.mubr.msk.f32.mxu1 %vm4026_vm0, %v4027_v6 }
0x13b1   :  { %3682 = vmatprep.subr.bf16.mxu1 %v4024_v3  ;;  %3693 = vmatpush3.bf16.msra.mxu0 %v4232_v63 }
0x13b2   :  { %3694 = vmatprep.subr.bf16.mxu0 %v4024_v3  ;;  %3526 = vmatprep.mubr.msk.f32.mxu0 %vm4026_vm0, %v4027_v6 }
0x13b4   :  { %3684 = vmatpush3.bf16.msra.mxu1 %v4248_v17  ;;  %v2165_v38 = vpop.permute.xlu1 %2164 }
0x13b5   :  { %3696 = vmatpush3.bf16.msra.mxu0 %v4235_v1 }
0x13b6   :  { %3697 = vmatprep.subr.bf16.mxu0 %v4024_v3 }
0x13b7   :  { %3505 = vmatmul.mubr.msk.f32.vlgmr.msra.gmra.mrb[14].mxu1 %vm319_vm3, %v2165_v38  ;;  %v2810_v38 = vld [vmem:[%s4683_s7 + $0x8] sm:$0xff] }
0x1482   :  { %v2329_v40 = vpop.f32.mrb[14].mxu0 }
0x1483   :  { %v2333_v37 = vadd.f32 %v2329_v40, %v297_v39  ;;  %v3517_v63 = vpop.f32.mrb[15].mxu0  ;;  %v2811_v39 = vld [vmem:[%s4683_s7 + $0x10] sm:$0xff] }
0x1484   :  { %v2812_v63 = vld [vmem:[%s4683_s7 + $0x18] sm:$0xff] }
0x1485   :  { %3858 = vtanh.f32 %v2333_v37  ;;  %v3118_v32 = vmul.f32 -1.442695, %v2333_v37  ;;  %v3703_v37 = vpack.c.bf16 %v2810_v38, %v2809_v33 }
0x1487   :  { %3704 = vmatprep.subr.bf16.mxu1 %v3703_v37 }
0x1488   :  { %3706 = vmatpush3.bf16.msra.mxu1 %v3703_v37  ;;  %v3127_v37 = vld [vmem:[%s4687_s11] ss:$0 sm:$0xff] }
0x148a   :  { %v2234_v29 = vpop.f32.mrb[14].mxu1 }
0x148b   :  { %v3717_v41 = vadd.f32 %v4273_v23, %v2234_v29  ;;  %v3506_v43 = vpop.f32.mrb[15].mxu1  ;;  %v3707_v29 = vpack.c.bf16 %v2812_v63, %v2811_v39 }
0x148d   :  { %3860 = vtanh.f32 %v3717_v41  ;;  %v3116_v49 = vmul.f32 -1.442695, %v3717_v41  ;;  %3708 = vmatprep.subr.bf16.mxu1 %v3707_v29 }
0x148e   :  { %3862 = vpow2.f32 %v3118_v32  ;;  %3710 = vmatpush3.bf16.msra.mxu1 %v3707_v29 }
0x148f   :  { %v3859_v44 = vpop.eup %3858  ;;  %3864 = vpow2.f32 %v3116_v49 }
0x1490   :  { %2343 = vrot.lane.b32.xlu0 %v3859_v44, %s4028_s21 }
0x1497   :  { %v3861_v1 = vpop.eup %3860 }
0x1498   :  { %2248 = vrot.lane.b32.xlu1 %v3861_v1, %s4028_s21  ;;  %v3863_v46 = vpop.eup %3862 }
0x1499   :  { %v2337_v50 = vadd.f32 1.0, %v3863_v46  ;;  %v3865_v51 = vpop.eup %3864 }
0x149a   :  { %v2242_v18 = vadd.f32 1.0, %v3865_v51 }
0x149b   :  { %3866 = vrcp.f32 %v2337_v50 }
0x149c   :  { %3868 = vrcp.f32 %v2242_v18 }
0x14a5   :  { %v3867_v52 = vpop.eup %3866 }
0x14a6   :  { %v3869_v54 = vpop.eup %3868  ;;  %v2341_v55 = vmul.f32 %v3867_v52, %v4553_v47 }
0x14a7   :  { %v2246_v59 = vmul.f32 %v3869_v54, %v4557_v14 }
0x1502   :  { %v2344_v23 = vpop.permute.xlu0 %2343 }
0x1503   :  { %v2346_v53 = vmul.f32 %v3867_v52, %v2344_v23 }
0x1505   :  { %2348 = vrot.lane.b32.xlu0 %v2346_v53, %s4020_s4  ;;  %v3122_v53 = vld [vmem:[%s4684_s8] ss:$0 sm:$0xff] }
0x150a   :  { %v2249_v36 = vpop.permute.xlu1 %2248 }
0x150b   :  { %v2251_v45 = vmul.f32 %v3869_v54, %v2249_v36 }
0x150d   :  { %2253 = vrot.lane.b32.xlu1 %v2251_v45, %s4020_s4 }
0x1577   :  { %v2349_v56 = vpop.permute.xlu0 %2348 }
0x1578   :  { %v2351_v58 = vadd.f32 %v2349_v56, %v2341_v55  ;;  %v3125_v56 = vld [vmem:[%s4685_s9] ss:$0 sm:$0xff] }
0x157a   :  { %3870 = vtanh.f32 %v2351_v58 }
0x157f   :  { %v2254_v61 = vpop.permute.xlu1 %2253 }
0x1580   :  { %v2256_v62 = vadd.f32 %v2254_v61, %v2246_v59 }
0x1582   :  { %3872 = vtanh.f32 %v2256_v62 }
0x1584   :  { %v3871_v0 = vpop.eup %3870 }
0x1585   :  { %2354 = vrot.lane.b32.xlu0 %v3871_v0, %s4028_s21 }
0x158c   :  { %v3873_v4 = vpop.eup %3872 }
0x158d   :  { %2259 = vrot.lane.b32.xlu1 %v3873_v4, %s4028_s21 }
0x15f7   :  { %v2355_v57 = vpop.permute.xlu0 %2354 }
0x15f8   :  { %v2357_v5 = vmul.f32 %v3867_v52, %v2355_v57  ;;  %v3126_v57 = vld [vmem:[#allocation2] ss:$0 sm:$0xff] }
0x15fa   :  { %v2365_v7 = vrot.slane %v2357_v5, %v4189_v16  ;;  %v2938_v5 = vand.u32 127, %v149_v2 }
0x15fc   :  { %2366 = vrot.lane.b32.xlu0 %v2365_v7, %s4020_s4 }
0x15ff   :  { %v2260_v9 = vpop.permute.xlu1 %2259 }
0x1600   :  { %v2262_v10 = vmul.f32 %v3869_v54, %v2260_v9  ;;  %v2941_v9 = vsub.s32 %v2938_v5, %v4186_v8 }
0x1602   :  { %v2680_v47 = vrot.slane %v2262_v10, %v4339_v42  ;;  %2441 = vrot.lane.b32.xlu1 %v2262_v10, %s4020_s4 }
0x1604   :  { %v2681_v11 = vcombine.high %v2680_v47, %v2680_v47  ;;  %v2688_v13 = vrot.slane %v2680_v47, %v4339_v42 }
0x1606   :  { %v2695_v14 = vrot.slane %v2681_v11, %v4339_v42  ;;  %v2772_v15 = vrot.slane %v2688_v13, %v4345_v48 }
0x1608   :  { %v2804_v60 = vsel %vm2803_vm8, %v4571_v35, %v2772_v15  ;;  %v2776_v16 = vrot.slane %v2695_v14, %v4345_v48 }
0x160a   :  { %v2805_v19 = vsel %vm2803_vm8, %v4574_v30, %v2776_v16 }
0x166e   :  { %v2367_v20 = vpop.permute.xlu0 %2366 }
0x166f   :  { %3527 = vmatmul.mubr.msk.f32.vlgmr.msra.gmra.mrb[16].mxu0 %vm319_vm3, %v2367_v20 }
0x1670   :  { %3699 = vmatpush3.bf16.msra.mxu0 %v4243_v12  ;;  %3537 = vmatprep.mubr.msk.f32.mxu0 %vm4026_vm0, %v4027_v6 }
0x1671   :  { %3700 = vmatprep.subr.bf16.mxu0 %v4024_v3 }
0x1674   :  { %3702 = vmatpush3.bf16.msra.mxu0 %v4248_v17  ;;  %v2442_v21 = vpop.permute.xlu1 %2441 }
0x1677   :  { %3538 = vmatmul.mubr.msk.f32.vlgmr.msra.gmra.mrb[16].mxu0 %vm319_vm3, %v2442_v21 }
0x174a   :  { %v2511_v22 = vpop.f32.mrb[16].mxu0 }
0x174b   :  { %v3718_v24 = vadd.f32 %v3898_v25, %v2511_v22  ;;  %v3539_v27 = vpop.f32.mrb[17].mxu0 }
0x174d   :  { %3874 = vtanh.f32 %v3718_v24  ;;  %v3121_v12 = vmul.f32 -1.442695, %v3718_v24 }
0x174f   :  { %3876 = vpow2.f32 %v3121_v12 }
0x1757   :  { %v3875_v28 = vpop.eup %3874 }
0x1758   :  { %2525 = vrot.lane.b32.xlu0 %v3875_v28, %s4028_s21 }
0x1759   :  { %v3877_v6 = vpop.eup %3876 }
0x175a   :  { %v2519_v3 = vadd.f32 1.0, %v3877_v6 }
0x175c   :  { %3878 = vrcp.f32 %v2519_v3 }
0x1766   :  { %v3879_v17 = vpop.eup %3878 }
0x1767   :  { %v2523_v34 = vmul.f32 %v3879_v17, %v2256_v62 }
0x17ca   :  { %v2526_v26 = vpop.permute.xlu0 %2525 }
0x17cb   :  { %v2528_v31 = vmul.f32 %v3879_v17, %v2526_v26 }
0x17cd   :  { %2530 = vrot.lane.b32.xlu1 %v2528_v31, %s4020_s4 }
0x183f   :  { %v2531_v35 = vpop.permute.xlu1 %2530 }
0x1840   :  { %v2533_v30 = vadd.f32 %v2531_v35, %v2523_v34 }
0x1842   :  { %3880 = vtanh.f32 %v2533_v30 }
0x184c   :  { %v3881_v40 = vpop.eup %3880 }
0x184d   :  { %2536 = vrot.lane.b32.xlu0 %v3881_v40, %s4028_s21 }
0x18bf   :  { %v2537_v41 = vpop.permute.xlu0 %2536 }
0x18c0   :  { %v2539_v43 = vmul.f32 %v3879_v17, %v2537_v41 }
0x18c2   :  { %v2703_v44 = vrot.slane %v2539_v43, %v4339_v42 }
0x18c4   :  { %v2704_v1 = vcombine.high %v2703_v44, %v2703_v44  ;;  %v2711_v32 = vrot.slane %v2703_v44, %v4339_v42 }
0x18c6   :  { %v2718_v49 = vrot.slane %v2704_v1, %v4339_v42  ;;  %v2782_v46 = vrot.slane %v2711_v32, %v4345_v48  ;;  %v4030_v42 = vmov 0  }
0x18c7   :  { %3752 = vset.pattern.permute.xlu0 %v4030_v42  ;;  %3753 = vset.pattern.permute.xlu1 %v4030_v42 }
0x18c8   :  { %v4640_v50 = vsel %vm2806_vm9, %v2804_v60, %v2782_v46  ;;  %v2786_v51 = vrot.slane %v2718_v49, %v4345_v48 }
0x18c9   :  { %2822 = vrot.lane.b32.xlu1 %v4640_v50, %s4020_s4 }
0x18ca   :  { %v4645_v18 = vsel %vm2806_vm9, %v2805_v19, %v2786_v51  ;;  %v2961_v19 = vsub.s32 1, %v4186_v8 }
0x18cb   :  { %2824 = vrot.lane.b32.xlu0 %v4645_v18, %s4020_s4 }
0x193b   :  { %v2823_v52 = vpop.permute.xlu1 %2822 }
0x193c   :  { %3548 = vmatprep.mubr.msk.f32.mxu1 %vm319_vm3, %v2823_v52 }
0x193d   :  { %v2825_v23 = vpop.permute.xlu0 %2824 }
0x193e   :  { %3549 = vmatmul.mubr.msk.f32.vlgmr.msra.gmra.mrb[16].mxu1 %vm319_vm3, %v2825_v23 }
0x1a11   :  { %v3550_v54 = vpop.f32.mrb[16].mxu1 }
0x1a12   :  { %v2902_v36 = vadd.f32 %v3550_v54, %v3122_v53  ;;  %v2896_v45 = vpop.f32.mrb[17].mxu1 }
0x1a13   :  { %v2897_v55 = vadd.f32 %v3122_v53, %v2896_v45 }
0x1a14   :  { %3882 = vtanh.f32 %v2902_v36 }
0x1a15   :  { %3884 = vtanh.f32 %v2897_v55 }
0x1a1e   :  { %v3883_v58 = vpop.eup %3882 }
0x1a1f   :  { %v3885_v59 = vpop.eup %3884  ;;  %v2915_v61 = vmul.f32 %v3883_v58, %v3125_v56 }
0x1a20   :  { %v2914_v62 = vmul.f32 %v3885_v59, %v3125_v56 }
0x1a21   :  { %v2920_v0 = vsel %vm2916_vm10, %v2915_v61, 0.0 }
0x1a22   :  { %2921 = vadd.xlane.f32.xlu0 %v2920_v0  ;;  %v2917_v4 = vsel %vm2916_vm10, %v2914_v62, 0.0  ;;  %v3128_v62 = vld [vmem:[#allocation3] ss:$0 sm:$0xff] }
0x1a23   :  { %2918 = vadd.xlane.f32.xlu1 %v2917_v4 }
0x1a38   :  { %2930 = vperm.xlu0 %3752, %v3126_v57  }
0x1aaf   :  { %v2922_v7 = vpop.xlane.xlu0 %2921 }
0x1ab0   :  { %v2919_v10 = vpop.xlane.xlu1 %2918 }
0x1ab7   :  { %v2931_v47 = vpop.permute.xlu0 %2930 }
0x1ab8   :  { %v2933_v11 = vadd.f32 %v2931_v47, %v2919_v10  ;;  %v2934_v13 = vadd.f32 %v2931_v47, %v2922_v7 }
0x1aba   :  { %v2942_v14 = vrot.slane %v2933_v11, %v2941_v9  ;;  %v2946_v15 = vrot.slane %v2934_v13, %v2941_v9 }
0x1abc   :  { %v2948_v60 = vsel %vm2947_vm11, %v2946_v15, %v2942_v14 }
0x1abd   :  { %v2951_v16 = vsel %vm2950_vm12, %v2948_v60, -inf }
0x1abe   :  { %2952 = vmax.xlane.f32.xlu1 %v2951_v16 }
0x1b4b   :  { %v2953_v20 = vpop.xlane.xlu1 %2952 }
0x1b4c   :  { %v2958_v2 = vrot.slane %v2953_v20, %v4345_v48  ;;  %v2962_v21 = vrot.slane %v2953_v20, %v2961_v19 }
0x1b4e   :  { %v2965_v22 = vsub.f32 %v2933_v11, %v2958_v2  ;;  %v2966_v25 = vsub.f32 %v2934_v13, %v2962_v21 }
0x1b50   :  { %v2967_v24 = vmul.f32 1.442695, %v2965_v22  ;;  %v2969_v27 = vmul.f32 1.442695, %v2966_v25 }
0x1b52   :  { %3886 = vpow2.f32 %v2967_v24 }
0x1b53   :  { %3888 = vpow2.f32 %v2969_v27 }
0x1b5c   :  { %v3887_v28 = vpop.eup %3886 }
0x1b5d   :  { %2974 = vperm.xlu1 %3753, %v3887_v28   ;;  %v3889_v12 = vpop.eup %3888 }
0x1b61   :  { %2977 = vperm.xlu1 %3753, %v3889_v12  }
0x1bdc   :  { %v2975_v6 = vpop.permute.xlu1 %2974 }
0x1bdd   :  { %v2982_v17 = vrot.slane %v2975_v6, %v2941_v9 }
0x1be0   :  { %v2978_v3 = vpop.permute.xlu1 %2977 }
0x1be1   :  { %v2986_v26 = vrot.slane %v2978_v3, %v2941_v9 }
0x1be3   :  { %v2987_v8 = vsel %vm2947_vm11, %v2986_v26, %v2982_v17 }
0x1be4   :  { %v2989_v31 = vsel %vm2950_vm12, %v2987_v8, 0.0 }
0x1be5   :  { %2990 = vadd.xlane.f32.xlu1 %v2989_v31 }
0x1c72   :  { %v2991_v34 = vpop.xlane.xlu1 %2990 }
0x1c73   :  { %v3000_v35 = vrot.slane %v2991_v34, %v2961_v19  ;;  %v2996_v30 = vrot.slane %v2991_v34, %v4345_v48 }
0x1c75   :  { %3890 = vrcp.f32 %v3000_v35 }
0x1c76   :  { %3892 = vrcp.f32 %v2996_v30 }
0x1c7f   :  { %v3891_v33 = vpop.eup %3890 }
0x1c80   :  { %v3006_v38 = vmul.f32 %v3891_v33, %v3889_v12  ;;  %v3893_v39 = vpop.eup %3892 }
0x1c81   :  { %v3004_v40 = vmul.f32 %v3893_v39, %v3887_v28 }
0x1c82   :  { %3014 = vperm.xlu0 %3752, %v3006_v38  }
0x1c86   :  { %3009 = vperm.xlu0 %3752, %v3004_v40  }
0x1c8a   :  { %3040 = vrot.lane.b32.xlu0 %v3127_v37, %s4031_s14 }
0x1d01   :  { %v3015_v63 = vpop.permute.xlu0 %3014 }
0x1d02   :  { %v3018_v29 = vmul.f32 %v3015_v63, %v4645_v18 }
0x1d04   :  { %v3027_v41 = vsel %vm3019_vm13, %v3018_v29, 0.0 }
0x1d05   :  { %v3028_v48 = vrot.slane %v3027_v41, 4  ;;  %v3010_v43 = vpop.permute.xlu0 %3009 }
0x1d06   :  { %v3017_v44 = vmul.f32 %v3010_v43, %v4640_v50 }
0x1d07   :  { %v3029_v1 = vadd.f32 %v3028_v48, %v3027_v41 }
0x1d08   :  { %v3020_v32 = vsel %vm3019_vm13, %v3017_v44, 0.0 }
0x1d09   :  { %v3030_v49 = vrot.slane %v3029_v1, 2  ;;  %v3021_v46 = vrot.slane %v3020_v32, 4  ;;  %v3041_v53 = vpop.permute.xlu0 %3040 }
0x1d0b   :  { %v3031_v51 = vadd.f32 %v3030_v49, %v3029_v1  ;;  %v3022_v52 = vadd.f32 %v3021_v46, %v3020_v32 }
0x1d0d   :  { %v3023_v23 = vrot.slane %v3022_v52, 2  ;;  %v3032_v42 = vrot.slane %v3031_v51, 1 }
0x1d0f   :  { %v3024_v54 = vadd.f32 %v3023_v23, %v3022_v52  ;;  %v3033_v36 = vadd.f32 %v3032_v42, %v3031_v51 }
0x1d11   :  { %v3025_v45 = vrot.slane %v3024_v54, 1  ;;  %v3044_v55 = vmul.f32 %v3041_v53, %v3033_v36 }
0x1d13   :  { %v3026_v56 = vadd.f32 %v3025_v45, %v3024_v54  ;;  %v3047_v58 = vrot.slane %v3044_v55, 7 }
0x1d15   :  { %v3043_v18 = vmul.f32 %v3041_v53, %v3026_v56 }
0x1d17   :  { %v3048_v59 = vsel %vm2947_vm11, %v3047_v58, %v3043_v18 }
0x1d18   :  { %3049 = vrot.lane.b32.xlu0 %v3048_v59, %s4020_s4 }
0x1d8a   :  { %v3050_v50 = vpop.permute.xlu0 %3049 }
0x1d8b   :  { %v3053_v61 = vsel %vm3052_vm14, %v3050_v50, 0.0 }
0x1d8c   :  { %3054 = vadd.xlane.f32.xlu0 %v3053_v61 }
0x1e19   :  { %v3055_v0 = vpop.xlane.xlu0 %3054 }
0x1e1a   :  { %v3063_v4 = vadd.f32 %v3128_v62, %v3055_v0 }
0x1e1c   :  { %v3129_v57 = vmul.f32 -1.442695, %v3063_v4 }
0x1e1e   :  { %3894 = vpow2.f32 %v3129_v57 }
0x1e28   :  { %v3895_v5 = vpop.eup %3894 }
0x1e29   :  { %v3067_v7 = vadd.f32 1.0, %v3895_v5 }
0x1e2b   :  { %3896 = vrcp.f32 %v3067_v7 }
0x1e35   :  { %v3897_v9 = vpop.eup %3896 }
0x1e36   :  { %3071 = vst.msk [vmem:[%s4688_s13] sm:$0x3] %vm3070_vm15, %v3897_v9 }
0x1e37   :  { %3076 = vsyncpa [#allocation5], 1 }
0x1e38   :  { %3077 = vsyncpa [#allocation7], 1 }
0x1e39   :  { %3078 = vsyncpa [#allocation10], 1 }

</bundles_post_ra>
